<compile_context>
chip_gen: v6e
topology: v6e:2x2x1
jax: 0.10.0
libtpu: 0.0.40
codegen_flags: <defaults>
</compile_context>

<pallas_src>
import functools
import math

import jax
import jax.numpy as jnp
from jax.experimental import pallas as pl
from jax.experimental.pallas import tpu as pltpu


# --------------------------- fused model kernel -------------------------------
def make_fused_lstm_kernel(num_layers, T, B, H):
    """Builds the fused kernel body for a fixed (static) model configuration.

    Ref layout (positional):
      x_ref                     : (T*B, D_in)   time-major flattened input
      per layer l (3 refs)      : w_ih_t (D_in_l, 4H), w_hh_t (H, 4H), bias (1, 4H)
      fcw_ref                   : (H, O)        FC weight, pre-transposed
      fcb_ref                   : (1, O)        FC bias
      out_ref                   : (B, O)        model output
      hseq_ref (scratch, VMEM)  : (T*B, H)      inter-layer hidden sequence
    """

    def kernel(*refs):
        x_ref = refs[0]
        layer_refs = refs[1:1 + 3 * num_layers]
        fcw_ref = refs[1 + 3 * num_layers]
        fcb_ref = refs[2 + 3 * num_layers]
        out_ref = refs[3 + 3 * num_layers]
        hseq_ref = refs[4 + 3 * num_layers]

        for layer in range(num_layers):
            w_ih_t = layer_refs[3 * layer][...]      # (D_in_l, 4H)
            w_hh_t = layer_refs[3 * layer + 1][...]  # (H, 4H)
            bias = layer_refs[3 * layer + 2][...]    # (1, 4H)

            # Hoisted input projection: one big matmul for all timesteps.
            layer_in = x_ref[...] if layer == 0 else hseq_ref[...]
            gates_x = (
                jnp.dot(layer_in, w_ih_t, preferred_element_type=jnp.float32)
                + bias
            )  # (T*B, 4H)

            h = jnp.zeros((B, H), jnp.float32)
            c = jnp.zeros((B, H), jnp.float32)
            last_layer = layer == num_layers - 1

            # Unrolled time recurrence (T static & small); only h @ W_hh^T is serial.
            for t in range(T):
                g = gates_x[t * B:(t + 1) * B, :] + jnp.dot(
                    h, w_hh_t, preferred_element_type=jnp.float32
                )  # (B, 4H), PyTorch gate order i, f, g, o
                i_g = jax.nn.sigmoid(g[:, 0 * H:1 * H])
                f_g = jax.nn.sigmoid(g[:, 1 * H:2 * H])
                g_g = jnp.tanh(g[:, 2 * H:3 * H])
                o_g = jax.nn.sigmoid(g[:, 3 * H:4 * H])
                c = f_g * c + i_g * g_g
                h = o_g * jnp.tanh(c)
                if not last_layer:
                    # Intermediate hidden sequence stays in VMEM scratch.
                    hseq_ref[t * B:(t + 1) * B, :] = h

            if last_layer:
                # FC on the last timestep's hidden state of the last layer.
                out_ref[...] = (
                    jnp.dot(h, fcw_ref[...], preferred_element_type=jnp.float32)
                    + fcb_ref[...]
                )

    return kernel


# --------------------------------- wrapper ------------------------------------
@jax.jit
def lstm_model_forward(x, kparams):
    """x: (B, T, input_dim) batch_first, like the PyTorch module."""
    B, T, D = x.shape
    layers = kparams["layers"]
    num_layers = len(layers)
    H = layers[0]["w_hh_t"].shape[0]
    O = kparams["fc_w_t"].shape[1]

    # time-major, flattened: row t*B + b  <->  (time t, batch b)
    x_flat = jnp.transpose(x, (1, 0, 2)).reshape(T * B, D).astype(jnp.float32)

    kernel = make_fused_lstm_kernel(num_layers, T, B, H)
    vmem = pl.BlockSpec(memory_space=pltpu.MemorySpace.VMEM)

    inputs = [x_flat]
    for lp in layers:
        inputs += [lp["w_ih_t"], lp["w_hh_t"], lp["b"]]
    inputs += [kparams["fc_w_t"], kparams["fc_b"]]

    return pl.pallas_call(
        kernel,
        out_shape=jax.ShapeDtypeStruct((B, O), jnp.float32),
        in_specs=[vmem] * len(inputs),
        out_specs=vmem,
        scratch_shapes=[pltpu.VMEM((T * B, H), jnp.float32)],
    )(*inputs)


# ----------------------------- params / init ----------------------------------
def init_params(key, input_dim, hidden_dim, num_layers, output_dim):
    """Deterministic init mirroring nn.LSTM / nn.Linear shapes (uniform ±1/sqrt(H))."""
    params = {"lstm": [], "fc": {}}
    k = 1.0 / math.sqrt(hidden_dim)
    for layer in range(num_layers):
        d_in = input_dim if layer == 0 else hidden_dim
        key, k1, k2, k3, k4 = jax.random.split(key, 5)
        params["lstm"].append({
            "w_ih": jax.random.uniform(k1, (4 * hidden_dim, d_in), jnp.float32, -k, k),
            "w_hh": jax.random.uniform(k2, (4 * hidden_dim, hidden_dim), jnp.float32, -k, k),
            "b_ih": jax.random.uniform(k3, (4 * hidden_dim,), jnp.float32, -k, k),
            "b_hh": jax.random.uniform(k4, (4 * hidden_dim,), jnp.float32, -k, k),
        })
    kf = 1.0 / math.sqrt(hidden_dim)
    key, k1, k2 = jax.random.split(key, 3)
    params["fc"]["w"] = jax.random.uniform(k1, (output_dim, hidden_dim), jnp.float32, -kf, kf)
    params["fc"]["b"] = jax.random.uniform(k2, (output_dim,), jnp.float32, -kf, kf)
    return params


def prepare_kernel_params(params):
    """One-time preprocessing: transpose weights, fuse biases (done at init, not per call)."""
    layers = []
    for lp in params["lstm"]:
        layers.append({
            "w_ih_t": jnp.transpose(lp["w_ih"]),                 # (D_in, 4H)
            "w_hh_t": jnp.transpose(lp["w_hh"]),                 # (H, 4H)
            "b": (lp["b_ih"] + lp["b_hh"]).reshape(1, -1),       # (1, 4H)
        })
    return {
        "layers": layers,
        "fc_w_t": jnp.transpose(params["fc"]["w"]),              # (H, O)
        "fc_b": params["fc"]["b"].reshape(1, -1),                # (1, O)
    }


# ---------------------------- pure-JAX reference -------------------------------
def reference_forward(x, params):
    h_seq = jnp.transpose(x, (1, 0, 2)).astype(jnp.float32)
    for lp in params["lstm"]:
        H = lp["w_hh"].shape[1]
        B = h_seq.shape[1]
        wih_t = lp["w_ih"].T
        whh_t = lp["w_hh"].T
        bias = lp["b_ih"] + lp["b_hh"]

        def step(carry, x_t):
            h, c = carry
            g = x_t @ wih_t + h @ whh_t + bias
            i = jax.nn.sigmoid(g[:, 0 * H:1 * H])
            f = jax.nn.sigmoid(g[:, 1 * H:2 * H])
            gg = jnp.tanh(g[:, 2 * H:3 * H])
            o = jax.nn.sigmoid(g[:, 3 * H:4 * H])
            c = f * c + i * gg
            h = o * jnp.tanh(c)
            return (h, c), h

        init = (jnp.zeros((B, H), jnp.float32), jnp.zeros((B, H), jnp.float32))
        _, h_seq = jax.lax.scan(step, init, h_seq)
    return h_seq[-1] @ params["fc"]["w"].T + params["fc"]["b"]


if __name__ == "__main__":
    # Small shapes consistent with the module: batch=2, seq=8, input_dim=16,
    # hidden_dim=32, num_layers=2, output_dim=4.
    B, T, INPUT_DIM, HIDDEN_DIM, NUM_LAYERS, OUTPUT_DIM = 2, 8, 16, 32, 2, 4

    key = jax.random.PRNGKey(0)
    kx, kp = jax.random.split(key)
    x = jax.random.normal(kx, (B, T, INPUT_DIM), jnp.float32)
    params = init_params(kp, INPUT_DIM, HIDDEN_DIM, NUM_LAYERS, OUTPUT_DIM)
    kparams = prepare_kernel_params(params)

    out = lstm_model_forward(x, kparams)
    out = jax.block_until_ready(out)

    ref = reference_forward(x, params)
    assert out.shape == (B, OUTPUT_DIM)
    assert jnp.allclose(out, ref, atol=1e-4, rtol=1e-4), "mismatch vs reference"

    print("KERNEL_OK")
</pallas_src>

<mosaic_0001>
module attributes {stable_mosaic.version = 11 : i64} {
  func.func @kernel(%arg0: memref<16x16xf32, #tpu.memory_space<vmem>>, %arg1: memref<16x128xf32, #tpu.memory_space<vmem>>, %arg2: memref<32x128xf32, #tpu.memory_space<vmem>>, %arg3: memref<1x128xf32, #tpu.memory_space<vmem>>, %arg4: memref<32x128xf32, #tpu.memory_space<vmem>>, %arg5: memref<32x128xf32, #tpu.memory_space<vmem>>, %arg6: memref<1x128xf32, #tpu.memory_space<vmem>>, %arg7: memref<32x4xf32, #tpu.memory_space<vmem>>, %arg8: memref<1x4xf32, #tpu.memory_space<vmem>>, %arg9: memref<2x4xf32, #tpu.memory_space<vmem>>, %arg10: memref<16x32xf32, #tpu.memory_space<vmem>>) attributes {dimension_semantics = [], scalar_prefetch = 0 : i64, scratch_operands = 1 : i64, tpu.core_type = #tpu.core_type<tc>} {
    %c0 = arith.constant 0 : index
    %c0_0 = arith.constant 0 : index
    %0 = vector.load %arg1[%c0, %c0_0] : memref<16x128xf32, #tpu.memory_space<vmem>>, vector<16x128xf32>
    %c0_1 = arith.constant 0 : index
    %c0_2 = arith.constant 0 : index
    %1 = vector.load %arg2[%c0_1, %c0_2] : memref<32x128xf32, #tpu.memory_space<vmem>>, vector<32x128xf32>
    %c0_3 = arith.constant 0 : index
    %c0_4 = arith.constant 0 : index
    %2 = vector.load %arg3[%c0_3, %c0_4] : memref<1x128xf32, #tpu.memory_space<vmem>>, vector<1x128xf32>
    %c0_5 = arith.constant 0 : index
    %c0_6 = arith.constant 0 : index
    %3 = vector.load %arg0[%c0_5, %c0_6] : memref<16x16xf32, #tpu.memory_space<vmem>>, vector<16x16xf32>
    %cst = arith.constant dense<0.000000e+00> : vector<16x128xf32>
    %4 = tpu.matmul %3, %0, %cst {dimension_numbers = #tpu.dot_dimension_numbers<[1], [0], [0], [1], [0, 0, 1, 1], [], []>} : vector<16x16xf32>, vector<16x128xf32>, vector<16x128xf32> -> vector<16x128xf32>
    %5 = vector.broadcast %2 : vector<1x128xf32> to vector<16x128xf32>
    %6 = arith.addf %4, %5 : vector<16x128xf32>
    %cst_7 = arith.constant 0.000000e+00 : f32
    %7 = vector.broadcast %cst_7 : f32 to vector<2x32xf32>
    %cst_8 = arith.constant 0.000000e+00 : f32
    %8 = vector.broadcast %cst_8 : f32 to vector<2x32xf32>
    %9 = vector.extract_strided_slice %6 {offsets = [0, 0], sizes = [2, 128], strides = [1, 1]} : vector<16x128xf32> to vector<2x128xf32>
    %cst_9 = arith.constant dense<0.000000e+00> : vector<2x128xf32>
    %10 = tpu.matmul %7, %1, %cst_9 {dimension_numbers = #tpu.dot_dimension_numbers<[1], [0], [0], [1], [0, 0, 1, 1], [], []>} : vector<2x32xf32>, vector<32x128xf32>, vector<2x128xf32> -> vector<2x128xf32>
    %11 = arith.addf %9, %10 : vector<2x128xf32>
    %12 = vector.extract_strided_slice %11 {offsets = [0, 0], sizes = [2, 32], strides = [1, 1]} : vector<2x128xf32> to vector<2x32xf32>
    %13 = arith.negf %12 : vector<2x32xf32>
    %14 = math.exp %13 : vector<2x32xf32>
    %cst_10 = arith.constant 1.000000e+00 : f32
    %15 = vector.broadcast %cst_10 : f32 to vector<2x32xf32>
    %16 = arith.addf %15, %14 : vector<2x32xf32>
    %17 = arith.divf %15, %16 : vector<2x32xf32>
    %18 = vector.extract_strided_slice %11 {offsets = [0, 32], sizes = [2, 32], strides = [1, 1]} : vector<2x128xf32> to vector<2x32xf32>
    %19 = arith.negf %18 : vector<2x32xf32>
    %20 = math.exp %19 : vector<2x32xf32>
    %cst_11 = arith.constant 1.000000e+00 : f32
    %21 = vector.broadcast %cst_11 : f32 to vector<2x32xf32>
    %22 = arith.addf %21, %20 : vector<2x32xf32>
    %23 = arith.divf %21, %22 : vector<2x32xf32>
    %24 = vector.extract_strided_slice %11 {offsets = [0, 64], sizes = [2, 32], strides = [1, 1]} : vector<2x128xf32> to vector<2x32xf32>
    %25 = math.tanh %24 : vector<2x32xf32>
    %26 = vector.extract_strided_slice %11 {offsets = [0, 96], sizes = [2, 32], strides = [1, 1]} : vector<2x128xf32> to vector<2x32xf32>
    %27 = arith.negf %26 : vector<2x32xf32>
    %28 = math.exp %27 : vector<2x32xf32>
    %cst_12 = arith.constant 1.000000e+00 : f32
    %29 = vector.broadcast %cst_12 : f32 to vector<2x32xf32>
    %30 = arith.addf %29, %28 : vector<2x32xf32>
    %31 = arith.divf %29, %30 : vector<2x32xf32>
    %32 = arith.mulf %23, %8 : vector<2x32xf32>
    %33 = arith.mulf %17, %25 : vector<2x32xf32>
    %34 = arith.addf %32, %33 : vector<2x32xf32>
    %35 = math.tanh %34 : vector<2x32xf32>
    %36 = arith.mulf %31, %35 : vector<2x32xf32>
    %c0_13 = arith.constant 0 : index
    %c0_14 = arith.constant 0 : index
    %37 = vector.load %arg10[%c0_13, %c0_14] : memref<16x32xf32, #tpu.memory_space<vmem>>, vector<2x32xf32>
    tpu.vector_store %arg10[%c0_13, %c0_14], %36 {strides = array<i32>} : memref<16x32xf32, #tpu.memory_space<vmem>>, vector<2x32xf32>,
    %38 = vector.extract_strided_slice %6 {offsets = [2, 0], sizes = [2, 128], strides = [1, 1]} : vector<16x128xf32> to vector<2x128xf32>
    %cst_15 = arith.constant dense<0.000000e+00> : vector<2x128xf32>
    %39 = tpu.matmul %36, %1, %cst_15 {dimension_numbers = #tpu.dot_dimension_numbers<[1], [0], [0], [1], [0, 0, 1, 1], [], []>} : vector<2x32xf32>, vector<32x128xf32>, vector<2x128xf32> -> vector<2x128xf32>
    %40 = arith.addf %38, %39 : vector<2x128xf32>
    %41 = vector.extract_strided_slice %40 {offsets = [0, 0], sizes = [2, 32], strides = [1, 1]} : vector<2x128xf32> to vector<2x32xf32>
    %42 = arith.negf %41 : vector<2x32xf32>
    %43 = math.exp %42 : vector<2x32xf32>
    %cst_16 = arith.constant 1.000000e+00 : f32
    %44 = vector.broadcast %cst_16 : f32 to vector<2x32xf32>
    %45 = arith.addf %44, %43 : vector<2x32xf32>
    %46 = arith.divf %44, %45 : vector<2x32xf32>
    %47 = vector.extract_strided_slice %40 {offsets = [0, 32], sizes = [2, 32], strides = [1, 1]} : vector<2x128xf32> to vector<2x32xf32>
    %48 = arith.negf %47 : vector<2x32xf32>
    %49 = math.exp %48 : vector<2x32xf32>
    %cst_17 = arith.constant 1.000000e+00 : f32
    %50 = vector.broadcast %cst_17 : f32 to vector<2x32xf32>
    %51 = arith.addf %50, %49 : vector<2x32xf32>
    %52 = arith.divf %50, %51 : vector<2x32xf32>
    %53 = vector.extract_strided_slice %40 {offsets = [0, 64], sizes = [2, 32], strides = [1, 1]} : vector<2x128xf32> to vector<2x32xf32>
    %54 = math.tanh %53 : vector<2x32xf32>
    %55 = vector.extract_strided_slice %40 {offsets = [0, 96], sizes = [2, 32], strides = [1, 1]} : vector<2x128xf32> to vector<2x32xf32>
    %56 = arith.negf %55 : vector<2x32xf32>
    %57 = math.exp %56 : vector<2x32xf32>
    %cst_18 = arith.constant 1.000000e+00 : f32
    %58 = vector.broadcast %cst_18 : f32 to vector<2x32xf32>
    %59 = arith.addf %58, %57 : vector<2x32xf32>
    %60 = arith.divf %58, %59 : vector<2x32xf32>
    %61 = arith.mulf %52, %34 : vector<2x32xf32>
    %62 = arith.mulf %46, %54 : vector<2x32xf32>
    %63 = arith.addf %61, %62 : vector<2x32xf32>
    %64 = math.tanh %63 : vector<2x32xf32>
    %65 = arith.mulf %60, %64 : vector<2x32xf32>
    %c2 = arith.constant 2 : index
    %c0_19 = arith.constant 0 : index
    %66 = vector.load %arg10[%c2, %c0_19] : memref<16x32xf32, #tpu.memory_space<vmem>>, vector<2x32xf32>
    tpu.vector_store %arg10[%c2, %c0_19], %65 {strides = array<i32>} : memref<16x32xf32, #tpu.memory_space<vmem>>, vector<2x32xf32>,
    %67 = vector.extract_strided_slice %6 {offsets = [4, 0], sizes = [2, 128], strides = [1, 1]} : vector<16x128xf32> to vector<2x128xf32>
    %cst_20 = arith.constant dense<0.000000e+00> : vector<2x128xf32>
    %68 = tpu.matmul %65, %1, %cst_20 {dimension_numbers = #tpu.dot_dimension_numbers<[1], [0], [0], [1], [0, 0, 1, 1], [], []>} : vector<2x32xf32>, vector<32x128xf32>, vector<2x128xf32> -> vector<2x128xf32>
    %69 = arith.addf %67, %68 : vector<2x128xf32>
    %70 = vector.extract_strided_slice %69 {offsets = [0, 0], sizes = [2, 32], strides = [1, 1]} : vector<2x128xf32> to vector<2x32xf32>
    %71 = arith.negf %70 : vector<2x32xf32>
    %72 = math.exp %71 : vector<2x32xf32>
    %cst_21 = arith.constant 1.000000e+00 : f32
    %73 = vector.broadcast %cst_21 : f32 to vector<2x32xf32>
    %74 = arith.addf %73, %72 : vector<2x32xf32>
    %75 = arith.divf %73, %74 : vector<2x32xf32>
    %76 = vector.extract_strided_slice %69 {offsets = [0, 32], sizes = [2, 32], strides = [1, 1]} : vector<2x128xf32> to vector<2x32xf32>
    %77 = arith.negf %76 : vector<2x32xf32>
    %78 = math.exp %77 : vector<2x32xf32>
    %cst_22 = arith.constant 1.000000e+00 : f32
    %79 = vector.broadcast %cst_22 : f32 to vector<2x32xf32>
    %80 = arith.addf %79, %78 : vector<2x32xf32>
    %81 = arith.divf %79, %80 : vector<2x32xf32>
    %82 = vector.extract_strided_slice %69 {offsets = [0, 64], sizes = [2, 32], strides = [1, 1]} : vector<2x128xf32> to vector<2x32xf32>
    %83 = math.tanh %82 : vector<2x32xf32>
    %84 = vector.extract_strided_slice %69 {offsets = [0, 96], sizes = [2, 32], strides = [1, 1]} : vector<2x128xf32> to vector<2x32xf32>
    %85 = arith.negf %84 : vector<2x32xf32>
    %86 = math.exp %85 : vector<2x32xf32>
    %cst_23 = arith.constant 1.000000e+00 : f32
    %87 = vector.broadcast %cst_23 : f32 to vector<2x32xf32>
    %88 = arith.addf %87, %86 : vector<2x32xf32>
    %89 = arith.divf %87, %88 : vector<2x32xf32>
    %90 = arith.mulf %81, %63 : vector<2x32xf32>
    %91 = arith.mulf %75, %83 : vector<2x32xf32>
    %92 = arith.addf %90, %91 : vector<2x32xf32>
    %93 = math.tanh %92 : vector<2x32xf32>
    %94 = arith.mulf %89, %93 : vector<2x32xf32>
    %c4 = arith.constant 4 : index
    %c0_24 = arith.constant 0 : index
    %95 = vector.load %arg10[%c4, %c0_24] : memref<16x32xf32, #tpu.memory_space<vmem>>, vector<2x32xf32>
    tpu.vector_store %arg10[%c4, %c0_24], %94 {strides = array<i32>} : memref<16x32xf32, #tpu.memory_space<vmem>>, vector<2x32xf32>,
    %96 = vector.extract_strided_slice %6 {offsets = [6, 0], sizes = [2, 128], strides = [1, 1]} : vector<16x128xf32> to vector<2x128xf32>
    %cst_25 = arith.constant dense<0.000000e+00> : vector<2x128xf32>
    %97 = tpu.matmul %94, %1, %cst_25 {dimension_numbers = #tpu.dot_dimension_numbers<[1], [0], [0], [1], [0, 0, 1, 1], [], []>} : vector<2x32xf32>, vector<32x128xf32>, vector<2x128xf32> -> vector<2x128xf32>
    %98 = arith.addf %96, %97 : vector<2x128xf32>
    %99 = vector.extract_strided_slice %98 {offsets = [0, 0], sizes = [2, 32], strides = [1, 1]} : vector<2x128xf32> to vector<2x32xf32>
    %100 = arith.negf %99 : vector<2x32xf32>
    %101 = math.exp %100 : vector<2x32xf32>
    %cst_26 = arith.constant 1.000000e+00 : f32
    %102 = vector.broadcast %cst_26 : f32 to vector<2x32xf32>
    %103 = arith.addf %102, %101 : vector<2x32xf32>
    %104 = arith.divf %102, %103 : vector<2x32xf32>
    %105 = vector.extract_strided_slice %98 {offsets = [0, 32], sizes = [2, 32], strides = [1, 1]} : vector<2x128xf32> to vector<2x32xf32>
    %106 = arith.negf %105 : vector<2x32xf32>
    %107 = math.exp %106 : vector<2x32xf32>
    %cst_27 = arith.constant 1.000000e+00 : f32
    %108 = vector.broadcast %cst_27 : f32 to vector<2x32xf32>
    %109 = arith.addf %108, %107 : vector<2x32xf32>
    %110 = arith.divf %108, %109 : vector<2x32xf32>
    %111 = vector.extract_strided_slice %98 {offsets = [0, 64], sizes = [2, 32], strides = [1, 1]} : vector<2x128xf32> to vector<2x32xf32>
    %112 = math.tanh %111 : vector<2x32xf32>
    %113 = vector.extract_strided_slice %98 {offsets = [0, 96], sizes = [2, 32], strides = [1, 1]} : vector<2x128xf32> to vector<2x32xf32>
    %114 = arith.negf %113 : vector<2x32xf32>
    %115 = math.exp %114 : vector<2x32xf32>
    %cst_28 = arith.constant 1.000000e+00 : f32
    %116 = vector.broadcast %cst_28 : f32 to vector<2x32xf32>
    %117 = arith.addf %116, %115 : vector<2x32xf32>
    %118 = arith.divf %116, %117 : vector<2x32xf32>
    %119 = arith.mulf %110, %92 : vector<2x32xf32>
    %120 = arith.mulf %104, %112 : vector<2x32xf32>
    %121 = arith.addf %119, %120 : vector<2x32xf32>
    %122 = math.tanh %121 : vector<2x32xf32>
    %123 = arith.mulf %118, %122 : vector<2x32xf32>
    %c6 = arith.constant 6 : index
    %c0_29 = arith.constant 0 : index
    %124 = vector.load %arg10[%c6, %c0_29] : memref<16x32xf32, #tpu.memory_space<vmem>>, vector<2x32xf32>
    tpu.vector_store %arg10[%c6, %c0_29], %123 {strides = array<i32>} : memref<16x32xf32, #tpu.memory_space<vmem>>, vector<2x32xf32>,
    %125 = vector.extract_strided_slice %6 {offsets = [8, 0], sizes = [2, 128], strides = [1, 1]} : vector<16x128xf32> to vector<2x128xf32>
    %cst_30 = arith.constant dense<0.000000e+00> : vector<2x128xf32>
    %126 = tpu.matmul %123, %1, %cst_30 {dimension_numbers = #tpu.dot_dimension_numbers<[1], [0], [0], [1], [0, 0, 1, 1], [], []>} : vector<2x32xf32>, vector<32x128xf32>, vector<2x128xf32> -> vector<2x128xf32>
    %127 = arith.addf %125, %126 : vector<2x128xf32>
    %128 = vector.extract_strided_slice %127 {offsets = [0, 0], sizes = [2, 32], strides = [1, 1]} : vector<2x128xf32> to vector<2x32xf32>
    %129 = arith.negf %128 : vector<2x32xf32>
    %130 = math.exp %129 : vector<2x32xf32>
    %cst_31 = arith.constant 1.000000e+00 : f32
    %131 = vector.broadcast %cst_31 : f32 to vector<2x32xf32>
    %132 = arith.addf %131, %130 : vector<2x32xf32>
    %133 = arith.divf %131, %132 : vector<2x32xf32>
    %134 = vector.extract_strided_slice %127 {offsets = [0, 32], sizes = [2, 32], strides = [1, 1]} : vector<2x128xf32> to vector<2x32xf32>
    %135 = arith.negf %134 : vector<2x32xf32>
    %136 = math.exp %135 : vector<2x32xf32>
    %cst_32 = arith.constant 1.000000e+00 : f32
    %137 = vector.broadcast %cst_32 : f32 to vector<2x32xf32>
    %138 = arith.addf %137, %136 : vector<2x32xf32>
    %139 = arith.divf %137, %138 : vector<2x32xf32>
    %140 = vector.extract_strided_slice %127 {offsets = [0, 64], sizes = [2, 32], strides = [1, 1]} : vector<2x128xf32> to vector<2x32xf32>
    %141 = math.tanh %140 : vector<2x32xf32>
    %142 = vector.extract_strided_slice %127 {offsets = [0, 96], sizes = [2, 32], strides = [1, 1]} : vector<2x128xf32> to vector<2x32xf32>
    %143 = arith.negf %142 : vector<2x32xf32>
    %144 = math.exp %143 : vector<2x32xf32>
    %cst_33 = arith.constant 1.000000e+00 : f32
    %145 = vector.broadcast %cst_33 : f32 to vector<2x32xf32>
    %146 = arith.addf %145, %144 : vector<2x32xf32>
    %147 = arith.divf %145, %146 : vector<2x32xf32>
    %148 = arith.mulf %139, %121 : vector<2x32xf32>
    %149 = arith.mulf %133, %141 : vector<2x32xf32>
    %150 = arith.addf %148, %149 : vector<2x32xf32>
    %151 = math.tanh %150 : vector<2x32xf32>
    %152 = arith.mulf %147, %151 : vector<2x32xf32>
    %c8 = arith.constant 8 : index
    %c0_34 = arith.constant 0 : index
    %153 = vector.load %arg10[%c8, %c0_34] : memref<16x32xf32, #tpu.memory_space<vmem>>, vector<2x32xf32>
    tpu.vector_store %arg10[%c8, %c0_34], %152 {strides = array<i32>} : memref<16x32xf32, #tpu.memory_space<vmem>>, vector<2x32xf32>,
    %154 = vector.extract_strided_slice %6 {offsets = [10, 0], sizes = [2, 128], strides = [1, 1]} : vector<16x128xf32> to vector<2x128xf32>
    %cst_35 = arith.constant dense<0.000000e+00> : vector<2x128xf32>
    %155 = tpu.matmul %152, %1, %cst_35 {dimension_numbers = #tpu.dot_dimension_numbers<[1], [0], [0], [1], [0, 0, 1, 1], [], []>} : vector<2x32xf32>, vector<32x128xf32>, vector<2x128xf32> -> vector<2x128xf32>
    %156 = arith.addf %154, %155 : vector<2x128xf32>
    %157 = vector.extract_strided_slice %156 {offsets = [0, 0], sizes = [2, 32], strides = [1, 1]} : vector<2x128xf32> to vector<2x32xf32>
    %158 = arith.negf %157 : vector<2x32xf32>
    %159 = math.exp %158 : vector<2x32xf32>
    %cst_36 = arith.constant 1.000000e+00 : f32
    %160 = vector.broadcast %cst_36 : f32 to vector<2x32xf32>
    %161 = arith.addf %160, %159 : vector<2x32xf32>
    %162 = arith.divf %160, %161 : vector<2x32xf32>
    %163 = vector.extract_strided_slice %156 {offsets = [0, 32], sizes = [2, 32], strides = [1, 1]} : vector<2x128xf32> to vector<2x32xf32>
    %164 = arith.negf %163 : vector<2x32xf32>
    %165 = math.exp %164 : vector<2x32xf32>
    %cst_37 = arith.constant 1.000000e+00 : f32
    %166 = vector.broadcast %cst_37 : f32 to vector<2x32xf32>
    %167 = arith.addf %166, %165 : vector<2x32xf32>
    %168 = arith.divf %166, %167 : vector<2x32xf32>
    %169 = vector.extract_strided_slice %156 {offsets = [0, 64], sizes = [2, 32], strides = [1, 1]} : vector<2x128xf32> to vector<2x32xf32>
    %170 = math.tanh %169 : vector<2x32xf32>
    %171 = vector.extract_strided_slice %156 {offsets = [0, 96], sizes = [2, 32], strides = [1, 1]} : vector<2x128xf32> to vector<2x32xf32>
    %172 = arith.negf %171 : vector<2x32xf32>
    %173 = math.exp %172 : vector<2x32xf32>
    %cst_38 = arith.constant 1.000000e+00 : f32
    %174 = vector.broadcast %cst_38 : f32 to vector<2x32xf32>
    %175 = arith.addf %174, %173 : vector<2x32xf32>
    %176 = arith.divf %174, %175 : vector<2x32xf32>
    %177 = arith.mulf %168, %150 : vector<2x32xf32>
    %178 = arith.mulf %162, %170 : vector<2x32xf32>
    %179 = arith.addf %177, %178 : vector<2x32xf32>
    %180 = math.tanh %179 : vector<2x32xf32>
    %181 = arith.mulf %176, %180 : vector<2x32xf32>
    %c10 = arith.constant 10 : index
    %c0_39 = arith.constant 0 : index
    %182 = vector.load %arg10[%c10, %c0_39] : memref<16x32xf32, #tpu.memory_space<vmem>>, vector<2x32xf32>
    tpu.vector_store %arg10[%c10, %c0_39], %181 {strides = array<i32>} : memref<16x32xf32, #tpu.memory_space<vmem>>, vector<2x32xf32>,
    %183 = vector.extract_strided_slice %6 {offsets = [12, 0], sizes = [2, 128], strides = [1, 1]} : vector<16x128xf32> to vector<2x128xf32>
    %cst_40 = arith.constant dense<0.000000e+00> : vector<2x128xf32>
    %184 = tpu.matmul %181, %1, %cst_40 {dimension_numbers = #tpu.dot_dimension_numbers<[1], [0], [0], [1], [0, 0, 1, 1], [], []>} : vector<2x32xf32>, vector<32x128xf32>, vector<2x128xf32> -> vector<2x128xf32>
    %185 = arith.addf %183, %184 : vector<2x128xf32>
    %186 = vector.extract_strided_slice %185 {offsets = [0, 0], sizes = [2, 32], strides = [1, 1]} : vector<2x128xf32> to vector<2x32xf32>
    %187 = arith.negf %186 : vector<2x32xf32>
    %188 = math.exp %187 : vector<2x32xf32>
    %cst_41 = arith.constant 1.000000e+00 : f32
    %189 = vector.broadcast %cst_41 : f32 to vector<2x32xf32>
    %190 = arith.addf %189, %188 : vector<2x32xf32>
    %191 = arith.divf %189, %190 : vector<2x32xf32>
    %192 = vector.extract_strided_slice %185 {offsets = [0, 32], sizes = [2, 32], strides = [1, 1]} : vector<2x128xf32> to vector<2x32xf32>
    %193 = arith.negf %192 : vector<2x32xf32>
    %194 = math.exp %193 : vector<2x32xf32>
    %cst_42 = arith.constant 1.000000e+00 : f32
    %195 = vector.broadcast %cst_42 : f32 to vector<2x32xf32>
    %196 = arith.addf %195, %194 : vector<2x32xf32>
    %197 = arith.divf %195, %196 : vector<2x32xf32>
    %198 = vector.extract_strided_slice %185 {offsets = [0, 64], sizes = [2, 32], strides = [1, 1]} : vector<2x128xf32> to vector<2x32xf32>
    %199 = math.tanh %198 : vector<2x32xf32>
    %200 = vector.extract_strided_slice %185 {offsets = [0, 96], sizes = [2, 32], strides = [1, 1]} : vector<2x128xf32> to vector<2x32xf32>
    %201 = arith.negf %200 : vector<2x32xf32>
    %202 = math.exp %201 : vector<2x32xf32>
    %cst_43 = arith.constant 1.000000e+00 : f32
    %203 = vector.broadcast %cst_43 : f32 to vector<2x32xf32>
    %204 = arith.addf %203, %202 : vector<2x32xf32>
    %205 = arith.divf %203, %204 : vector<2x32xf32>
    %206 = arith.mulf %197, %179 : vector<2x32xf32>
    %207 = arith.mulf %191, %199 : vector<2x32xf32>
    %208 = arith.addf %206, %207 : vector<2x32xf32>
    %209 = math.tanh %208 : vector<2x32xf32>
    %210 = arith.mulf %205, %209 : vector<2x32xf32>
    %c12 = arith.constant 12 : index
    %c0_44 = arith.constant 0 : index
    %211 = vector.load %arg10[%c12, %c0_44] : memref<16x32xf32, #tpu.memory_space<vmem>>, vector<2x32xf32>
    tpu.vector_store %arg10[%c12, %c0_44], %210 {strides = array<i32>} : memref<16x32xf32, #tpu.memory_space<vmem>>, vector<2x32xf32>,
    %212 = vector.extract_strided_slice %6 {offsets = [14, 0], sizes = [2, 128], strides = [1, 1]} : vector<16x128xf32> to vector<2x128xf32>
    %cst_45 = arith.constant dense<0.000000e+00> : vector<2x128xf32>
    %213 = tpu.matmul %210, %1, %cst_45 {dimension_numbers = #tpu.dot_dimension_numbers<[1], [0], [0], [1], [0, 0, 1, 1], [], []>} : vector<2x32xf32>, vector<32x128xf32>, vector<2x128xf32> -> vector<2x128xf32>
    %214 = arith.addf %212, %213 : vector<2x128xf32>
    %215 = vector.extract_strided_slice %214 {offsets = [0, 0], sizes = [2, 32], strides = [1, 1]} : vector<2x128xf32> to vector<2x32xf32>
    %216 = arith.negf %215 : vector<2x32xf32>
    %217 = math.exp %216 : vector<2x32xf32>
    %cst_46 = arith.constant 1.000000e+00 : f32
    %218 = vector.broadcast %cst_46 : f32 to vector<2x32xf32>
    %219 = arith.addf %218, %217 : vector<2x32xf32>
    %220 = arith.divf %218, %219 : vector<2x32xf32>
    %221 = vector.extract_strided_slice %214 {offsets = [0, 32], sizes = [2, 32], strides = [1, 1]} : vector<2x128xf32> to vector<2x32xf32>
    %222 = arith.negf %221 : vector<2x32xf32>
    %223 = math.exp %222 : vector<2x32xf32>
    %cst_47 = arith.constant 1.000000e+00 : f32
    %224 = vector.broadcast %cst_47 : f32 to vector<2x32xf32>
    %225 = arith.addf %224, %223 : vector<2x32xf32>
    %226 = arith.divf %224, %225 : vector<2x32xf32>
    %227 = vector.extract_strided_slice %214 {offsets = [0, 64], sizes = [2, 32], strides = [1, 1]} : vector<2x128xf32> to vector<2x32xf32>
    %228 = math.tanh %227 : vector<2x32xf32>
    %229 = vector.extract_strided_slice %214 {offsets = [0, 96], sizes = [2, 32], strides = [1, 1]} : vector<2x128xf32> to vector<2x32xf32>
    %230 = arith.negf %229 : vector<2x32xf32>
    %231 = math.exp %230 : vector<2x32xf32>
    %cst_48 = arith.constant 1.000000e+00 : f32
    %232 = vector.broadcast %cst_48 : f32 to vector<2x32xf32>
    %233 = arith.addf %232, %231 : vector<2x32xf32>
    %234 = arith.divf %232, %233 : vector<2x32xf32>
    %235 = arith.mulf %226, %208 : vector<2x32xf32>
    %236 = arith.mulf %220, %228 : vector<2x32xf32>
    %237 = arith.addf %235, %236 : vector<2x32xf32>
    %238 = math.tanh %237 : vector<2x32xf32>
    %239 = arith.mulf %234, %238 : vector<2x32xf32>
    %c14 = arith.constant 14 : index
    %c0_49 = arith.constant 0 : index
    %240 = vector.load %arg10[%c14, %c0_49] : memref<16x32xf32, #tpu.memory_space<vmem>>, vector<2x32xf32>
    tpu.vector_store %arg10[%c14, %c0_49], %239 {strides = array<i32>} : memref<16x32xf32, #tpu.memory_space<vmem>>, vector<2x32xf32>,
    %c0_50 = arith.constant 0 : index
    %c0_51 = arith.constant 0 : index
    %241 = vector.load %arg4[%c0_50, %c0_51] : memref<32x128xf32, #tpu.memory_space<vmem>>, vector<32x128xf32>
    %c0_52 = arith.constant 0 : index
    %c0_53 = arith.constant 0 : index
    %242 = vector.load %arg5[%c0_52, %c0_53] : memref<32x128xf32, #tpu.memory_space<vmem>>, vector<32x128xf32>
    %c0_54 = arith.constant 0 : index
    %c0_55 = arith.constant 0 : index
    %243 = vector.load %arg6[%c0_54, %c0_55] : memref<1x128xf32, #tpu.memory_space<vmem>>, vector<1x128xf32>
    %c0_56 = arith.constant 0 : index
    %c0_57 = arith.constant 0 : index
    %244 = vector.load %arg10[%c0_56, %c0_57] : memref<16x32xf32, #tpu.memory_space<vmem>>, vector<16x32xf32>
    %cst_58 = arith.constant dense<0.000000e+00> : vector<16x128xf32>
    %245 = tpu.matmul %244, %241, %cst_58 {dimension_numbers = #tpu.dot_dimension_numbers<[1], [0], [0], [1], [0, 0, 1, 1], [], []>} : vector<16x32xf32>, vector<32x128xf32>, vector<16x128xf32> -> vector<16x128xf32>
    %246 = vector.broadcast %243 : vector<1x128xf32> to vector<16x128xf32>
    %247 = arith.addf %245, %246 : vector<16x128xf32>
    %cst_59 = arith.constant 0.000000e+00 : f32
    %248 = vector.broadcast %cst_59 : f32 to vector<2x32xf32>
    %cst_60 = arith.constant 0.000000e+00 : f32
    %249 = vector.broadcast %cst_60 : f32 to vector<2x32xf32>
    %250 = vector.extract_strided_slice %247 {offsets = [0, 0], sizes = [2, 128], strides = [1, 1]} : vector<16x128xf32> to vector<2x128xf32>
    %cst_61 = arith.constant dense<0.000000e+00> : vector<2x128xf32>
    %251 = tpu.matmul %248, %242, %cst_61 {dimension_numbers = #tpu.dot_dimension_numbers<[1], [0], [0], [1], [0, 0, 1, 1], [], []>} : vector<2x32xf32>, vector<32x128xf32>, vector<2x128xf32> -> vector<2x128xf32>
    %252 = arith.addf %250, %251 : vector<2x128xf32>
    %253 = vector.extract_strided_slice %252 {offsets = [0, 0], sizes = [2, 32], strides = [1, 1]} : vector<2x128xf32> to vector<2x32xf32>
    %254 = arith.negf %253 : vector<2x32xf32>
    %255 = math.exp %254 : vector<2x32xf32>
    %cst_62 = arith.constant 1.000000e+00 : f32
    %256 = vector.broadcast %cst_62 : f32 to vector<2x32xf32>
    %257 = arith.addf %256, %255 : vector<2x32xf32>
    %258 = arith.divf %256, %257 : vector<2x32xf32>
    %259 = vector.extract_strided_slice %252 {offsets = [0, 32], sizes = [2, 32], strides = [1, 1]} : vector<2x128xf32> to vector<2x32xf32>
    %260 = arith.negf %259 : vector<2x32xf32>
    %261 = math.exp %260 : vector<2x32xf32>
    %cst_63 = arith.constant 1.000000e+00 : f32
    %262 = vector.broadcast %cst_63 : f32 to vector<2x32xf32>
    %263 = arith.addf %262, %261 : vector<2x32xf32>
    %264 = arith.divf %262, %263 : vector<2x32xf32>
    %265 = vector.extract_strided_slice %252 {offsets = [0, 64], sizes = [2, 32], strides = [1, 1]} : vector<2x128xf32> to vector<2x32xf32>
    %266 = math.tanh %265 : vector<2x32xf32>
    %267 = vector.extract_strided_slice %252 {offsets = [0, 96], sizes = [2, 32], strides = [1, 1]} : vector<2x128xf32> to vector<2x32xf32>
    %268 = arith.negf %267 : vector<2x32xf32>
    %269 = math.exp %268 : vector<2x32xf32>
    %cst_64 = arith.constant 1.000000e+00 : f32
    %270 = vector.broadcast %cst_64 : f32 to vector<2x32xf32>
    %271 = arith.addf %270, %269 : vector<2x32xf32>
    %272 = arith.divf %270, %271 : vector<2x32xf32>
    %273 = arith.mulf %264, %249 : vector<2x32xf32>
    %274 = arith.mulf %258, %266 : vector<2x32xf32>
    %275 = arith.addf %273, %274 : vector<2x32xf32>
    %276 = math.tanh %275 : vector<2x32xf32>
    %277 = arith.mulf %272, %276 : vector<2x32xf32>
    %278 = vector.extract_strided_slice %247 {offsets = [2, 0], sizes = [2, 128], strides = [1, 1]} : vector<16x128xf32> to vector<2x128xf32>
    %cst_65 = arith.constant dense<0.000000e+00> : vector<2x128xf32>
    %279 = tpu.matmul %277, %242, %cst_65 {dimension_numbers = #tpu.dot_dimension_numbers<[1], [0], [0], [1], [0, 0, 1, 1], [], []>} : vector<2x32xf32>, vector<32x128xf32>, vector<2x128xf32> -> vector<2x128xf32>
    %280 = arith.addf %278, %279 : vector<2x128xf32>
    %281 = vector.extract_strided_slice %280 {offsets = [0, 0], sizes = [2, 32], strides = [1, 1]} : vector<2x128xf32> to vector<2x32xf32>
    %282 = arith.negf %281 : vector<2x32xf32>
    %283 = math.exp %282 : vector<2x32xf32>
    %cst_66 = arith.constant 1.000000e+00 : f32
    %284 = vector.broadcast %cst_66 : f32 to vector<2x32xf32>
    %285 = arith.addf %284, %283 : vector<2x32xf32>
    %286 = arith.divf %284, %285 : vector<2x32xf32>
    %287 = vector.extract_strided_slice %280 {offsets = [0, 32], sizes = [2, 32], strides = [1, 1]} : vector<2x128xf32> to vector<2x32xf32>
    %288 = arith.negf %287 : vector<2x32xf32>
    %289 = math.exp %288 : vector<2x32xf32>
    %cst_67 = arith.constant 1.000000e+00 : f32
    %290 = vector.broadcast %cst_67 : f32 to vector<2x32xf32>
    %291 = arith.addf %290, %289 : vector<2x32xf32>
    %292 = arith.divf %290, %291 : vector<2x32xf32>
    %293 = vector.extract_strided_slice %280 {offsets = [0, 64], sizes = [2, 32], strides = [1, 1]} : vector<2x128xf32> to vector<2x32xf32>
    %294 = math.tanh %293 : vector<2x32xf32>
    %295 = vector.extract_strided_slice %280 {offsets = [0, 96], sizes = [2, 32], strides = [1, 1]} : vector<2x128xf32> to vector<2x32xf32>
    %296 = arith.negf %295 : vector<2x32xf32>
    %297 = math.exp %296 : vector<2x32xf32>
    %cst_68 = arith.constant 1.000000e+00 : f32
    %298 = vector.broadcast %cst_68 : f32 to vector<2x32xf32>
    %299 = arith.addf %298, %297 : vector<2x32xf32>
    %300 = arith.divf %298, %299 : vector<2x32xf32>
    %301 = arith.mulf %292, %275 : vector<2x32xf32>
    %302 = arith.mulf %286, %294 : vector<2x32xf32>
    %303 = arith.addf %301, %302 : vector<2x32xf32>
    %304 = math.tanh %303 : vector<2x32xf32>
    %305 = arith.mulf %300, %304 : vector<2x32xf32>
    %306 = vector.extract_strided_slice %247 {offsets = [4, 0], sizes = [2, 128], strides = [1, 1]} : vector<16x128xf32> to vector<2x128xf32>
    %cst_69 = arith.constant dense<0.000000e+00> : vector<2x128xf32>
    %307 = tpu.matmul %305, %242, %cst_69 {dimension_numbers = #tpu.dot_dimension_numbers<[1], [0], [0], [1], [0, 0, 1, 1], [], []>} : vector<2x32xf32>, vector<32x128xf32>, vector<2x128xf32> -> vector<2x128xf32>
    %308 = arith.addf %306, %307 : vector<2x128xf32>
    %309 = vector.extract_strided_slice %308 {offsets = [0, 0], sizes = [2, 32], strides = [1, 1]} : vector<2x128xf32> to vector<2x32xf32>
    %310 = arith.negf %309 : vector<2x32xf32>
    %311 = math.exp %310 : vector<2x32xf32>
    %cst_70 = arith.constant 1.000000e+00 : f32
    %312 = vector.broadcast %cst_70 : f32 to vector<2x32xf32>
    %313 = arith.addf %312, %311 : vector<2x32xf32>
    %314 = arith.divf %312, %313 : vector<2x32xf32>
    %315 = vector.extract_strided_slice %308 {offsets = [0, 32], sizes = [2, 32], strides = [1, 1]} : vector<2x128xf32> to vector<2x32xf32>
    %316 = arith.negf %315 : vector<2x32xf32>
    %317 = math.exp %316 : vector<2x32xf32>
    %cst_71 = arith.constant 1.000000e+00 : f32
    %318 = vector.broadcast %cst_71 : f32 to vector<2x32xf32>
    %319 = arith.addf %318, %317 : vector<2x32xf32>
    %320 = arith.divf %318, %319 : vector<2x32xf32>
    %321 = vector.extract_strided_slice %308 {offsets = [0, 64], sizes = [2, 32], strides = [1, 1]} : vector<2x128xf32> to vector<2x32xf32>
    %322 = math.tanh %321 : vector<2x32xf32>
    %323 = vector.extract_strided_slice %308 {offsets = [0, 96], sizes = [2, 32], strides = [1, 1]} : vector<2x128xf32> to vector<2x32xf32>
    %324 = arith.negf %323 : vector<2x32xf32>
    %325 = math.exp %324 : vector<2x32xf32>
    %cst_72 = arith.constant 1.000000e+00 : f32
    %326 = vector.broadcast %cst_72 : f32 to vector<2x32xf32>
    %327 = arith.addf %326, %325 : vector<2x32xf32>
    %328 = arith.divf %326, %327 : vector<2x32xf32>
    %329 = arith.mulf %320, %303 : vector<2x32xf32>
    %330 = arith.mulf %314, %322 : vector<2x32xf32>
    %331 = arith.addf %329, %330 : vector<2x32xf32>
    %332 = math.tanh %331 : vector<2x32xf32>
    %333 = arith.mulf %328, %332 : vector<2x32xf32>
    %334 = vector.extract_strided_slice %247 {offsets = [6, 0], sizes = [2, 128], strides = [1, 1]} : vector<16x128xf32> to vector<2x128xf32>
    %cst_73 = arith.constant dense<0.000000e+00> : vector<2x128xf32>
    %335 = tpu.matmul %333, %242, %cst_73 {dimension_numbers = #tpu.dot_dimension_numbers<[1], [0], [0], [1], [0, 0, 1, 1], [], []>} : vector<2x32xf32>, vector<32x128xf32>, vector<2x128xf32> -> vector<2x128xf32>
    %336 = arith.addf %334, %335 : vector<2x128xf32>
    %337 = vector.extract_strided_slice %336 {offsets = [0, 0], sizes = [2, 32], strides = [1, 1]} : vector<2x128xf32> to vector<2x32xf32>
    %338 = arith.negf %337 : vector<2x32xf32>
    %339 = math.exp %338 : vector<2x32xf32>
    %cst_74 = arith.constant 1.000000e+00 : f32
    %340 = vector.broadcast %cst_74 : f32 to vector<2x32xf32>
    %341 = arith.addf %340, %339 : vector<2x32xf32>
    %342 = arith.divf %340, %341 : vector<2x32xf32>
    %343 = vector.extract_strided_slice %336 {offsets = [0, 32], sizes = [2, 32], strides = [1, 1]} : vector<2x128xf32> to vector<2x32xf32>
    %344 = arith.negf %343 : vector<2x32xf32>
    %345 = math.exp %344 : vector<2x32xf32>
    %cst_75 = arith.constant 1.000000e+00 : f32
    %346 = vector.broadcast %cst_75 : f32 to vector<2x32xf32>
    %347 = arith.addf %346, %345 : vector<2x32xf32>
    %348 = arith.divf %346, %347 : vector<2x32xf32>
    %349 = vector.extract_strided_slice %336 {offsets = [0, 64], sizes = [2, 32], strides = [1, 1]} : vector<2x128xf32> to vector<2x32xf32>
    %350 = math.tanh %349 : vector<2x32xf32>
    %351 = vector.extract_strided_slice %336 {offsets = [0, 96], sizes = [2, 32], strides = [1, 1]} : vector<2x128xf32> to vector<2x32xf32>
    %352 = arith.negf %351 : vector<2x32xf32>
    %353 = math.exp %352 : vector<2x32xf32>
    %cst_76 = arith.constant 1.000000e+00 : f32
    %354 = vector.broadcast %cst_76 : f32 to vector<2x32xf32>
    %355 = arith.addf %354, %353 : vector<2x32xf32>
    %356 = arith.divf %354, %355 : vector<2x32xf32>
    %357 = arith.mulf %348, %331 : vector<2x32xf32>
    %358 = arith.mulf %342, %350 : vector<2x32xf32>
    %359 = arith.addf %357, %358 : vector<2x32xf32>
    %360 = math.tanh %359 : vector<2x32xf32>
    %361 = arith.mulf %356, %360 : vector<2x32xf32>
    %362 = vector.extract_strided_slice %247 {offsets = [8, 0], sizes = [2, 128], strides = [1, 1]} : vector<16x128xf32> to vector<2x128xf32>
    %cst_77 = arith.constant dense<0.000000e+00> : vector<2x128xf32>
    %363 = tpu.matmul %361, %242, %cst_77 {dimension_numbers = #tpu.dot_dimension_numbers<[1], [0], [0], [1], [0, 0, 1, 1], [], []>} : vector<2x32xf32>, vector<32x128xf32>, vector<2x128xf32> -> vector<2x128xf32>
    %364 = arith.addf %362, %363 : vector<2x128xf32>
    %365 = vector.extract_strided_slice %364 {offsets = [0, 0], sizes = [2, 32], strides = [1, 1]} : vector<2x128xf32> to vector<2x32xf32>
    %366 = arith.negf %365 : vector<2x32xf32>
    %367 = math.exp %366 : vector<2x32xf32>
    %cst_78 = arith.constant 1.000000e+00 : f32
    %368 = vector.broadcast %cst_78 : f32 to vector<2x32xf32>
    %369 = arith.addf %368, %367 : vector<2x32xf32>
    %370 = arith.divf %368, %369 : vector<2x32xf32>
    %371 = vector.extract_strided_slice %364 {offsets = [0, 32], sizes = [2, 32], strides = [1, 1]} : vector<2x128xf32> to vector<2x32xf32>
    %372 = arith.negf %371 : vector<2x32xf32>
    %373 = math.exp %372 : vector<2x32xf32>
    %cst_79 = arith.constant 1.000000e+00 : f32
    %374 = vector.broadcast %cst_79 : f32 to vector<2x32xf32>
    %375 = arith.addf %374, %373 : vector<2x32xf32>
    %376 = arith.divf %374, %375 : vector<2x32xf32>
    %377 = vector.extract_strided_slice %364 {offsets = [0, 64], sizes = [2, 32], strides = [1, 1]} : vector<2x128xf32> to vector<2x32xf32>
    %378 = math.tanh %377 : vector<2x32xf32>
    %379 = vector.extract_strided_slice %364 {offsets = [0, 96], sizes = [2, 32], strides = [1, 1]} : vector<2x128xf32> to vector<2x32xf32>
    %380 = arith.negf %379 : vector<2x32xf32>
    %381 = math.exp %380 : vector<2x32xf32>
    %cst_80 = arith.constant 1.000000e+00 : f32
    %382 = vector.broadcast %cst_80 : f32 to vector<2x32xf32>
    %383 = arith.addf %382, %381 : vector<2x32xf32>
    %384 = arith.divf %382, %383 : vector<2x32xf32>
    %385 = arith.mulf %376, %359 : vector<2x32xf32>
    %386 = arith.mulf %370, %378 : vector<2x32xf32>
    %387 = arith.addf %385, %386 : vector<2x32xf32>
    %388 = math.tanh %387 : vector<2x32xf32>
    %389 = arith.mulf %384, %388 : vector<2x32xf32>
    %390 = vector.extract_strided_slice %247 {offsets = [10, 0], sizes = [2, 128], strides = [1, 1]} : vector<16x128xf32> to vector<2x128xf32>
    %cst_81 = arith.constant dense<0.000000e+00> : vector<2x128xf32>
    %391 = tpu.matmul %389, %242, %cst_81 {dimension_numbers = #tpu.dot_dimension_numbers<[1], [0], [0], [1], [0, 0, 1, 1], [], []>} : vector<2x32xf32>, vector<32x128xf32>, vector<2x128xf32> -> vector<2x128xf32>
    %392 = arith.addf %390, %391 : vector<2x128xf32>
    %393 = vector.extract_strided_slice %392 {offsets = [0, 0], sizes = [2, 32], strides = [1, 1]} : vector<2x128xf32> to vector<2x32xf32>
    %394 = arith.negf %393 : vector<2x32xf32>
    %395 = math.exp %394 : vector<2x32xf32>
    %cst_82 = arith.constant 1.000000e+00 : f32
    %396 = vector.broadcast %cst_82 : f32 to vector<2x32xf32>
    %397 = arith.addf %396, %395 : vector<2x32xf32>
    %398 = arith.divf %396, %397 : vector<2x32xf32>
    %399 = vector.extract_strided_slice %392 {offsets = [0, 32], sizes = [2, 32], strides = [1, 1]} : vector<2x128xf32> to vector<2x32xf32>
    %400 = arith.negf %399 : vector<2x32xf32>
    %401 = math.exp %400 : vector<2x32xf32>
    %cst_83 = arith.constant 1.000000e+00 : f32
    %402 = vector.broadcast %cst_83 : f32 to vector<2x32xf32>
    %403 = arith.addf %402, %401 : vector<2x32xf32>
    %404 = arith.divf %402, %403 : vector<2x32xf32>
    %405 = vector.extract_strided_slice %392 {offsets = [0, 64], sizes = [2, 32], strides = [1, 1]} : vector<2x128xf32> to vector<2x32xf32>
    %406 = math.tanh %405 : vector<2x32xf32>
    %407 = vector.extract_strided_slice %392 {offsets = [0, 96], sizes = [2, 32], strides = [1, 1]} : vector<2x128xf32> to vector<2x32xf32>
    %408 = arith.negf %407 : vector<2x32xf32>
    %409 = math.exp %408 : vector<2x32xf32>
    %cst_84 = arith.constant 1.000000e+00 : f32
    %410 = vector.broadcast %cst_84 : f32 to vector<2x32xf32>
    %411 = arith.addf %410, %409 : vector<2x32xf32>
    %412 = arith.divf %410, %411 : vector<2x32xf32>
    %413 = arith.mulf %404, %387 : vector<2x32xf32>
    %414 = arith.mulf %398, %406 : vector<2x32xf32>
    %415 = arith.addf %413, %414 : vector<2x32xf32>
    %416 = math.tanh %415 : vector<2x32xf32>
    %417 = arith.mulf %412, %416 : vector<2x32xf32>
    %418 = vector.extract_strided_slice %247 {offsets = [12, 0], sizes = [2, 128], strides = [1, 1]} : vector<16x128xf32> to vector<2x128xf32>
    %cst_85 = arith.constant dense<0.000000e+00> : vector<2x128xf32>
    %419 = tpu.matmul %417, %242, %cst_85 {dimension_numbers = #tpu.dot_dimension_numbers<[1], [0], [0], [1], [0, 0, 1, 1], [], []>} : vector<2x32xf32>, vector<32x128xf32>, vector<2x128xf32> -> vector<2x128xf32>
    %420 = arith.addf %418, %419 : vector<2x128xf32>
    %421 = vector.extract_strided_slice %420 {offsets = [0, 0], sizes = [2, 32], strides = [1, 1]} : vector<2x128xf32> to vector<2x32xf32>
    %422 = arith.negf %421 : vector<2x32xf32>
    %423 = math.exp %422 : vector<2x32xf32>
    %cst_86 = arith.constant 1.000000e+00 : f32
    %424 = vector.broadcast %cst_86 : f32 to vector<2x32xf32>
    %425 = arith.addf %424, %423 : vector<2x32xf32>
    %426 = arith.divf %424, %425 : vector<2x32xf32>
    %427 = vector.extract_strided_slice %420 {offsets = [0, 32], sizes = [2, 32], strides = [1, 1]} : vector<2x128xf32> to vector<2x32xf32>
    %428 = arith.negf %427 : vector<2x32xf32>
    %429 = math.exp %428 : vector<2x32xf32>
    %cst_87 = arith.constant 1.000000e+00 : f32
    %430 = vector.broadcast %cst_87 : f32 to vector<2x32xf32>
    %431 = arith.addf %430, %429 : vector<2x32xf32>
    %432 = arith.divf %430, %431 : vector<2x32xf32>
    %433 = vector.extract_strided_slice %420 {offsets = [0, 64], sizes = [2, 32], strides = [1, 1]} : vector<2x128xf32> to vector<2x32xf32>
    %434 = math.tanh %433 : vector<2x32xf32>
    %435 = vector.extract_strided_slice %420 {offsets = [0, 96], sizes = [2, 32], strides = [1, 1]} : vector<2x128xf32> to vector<2x32xf32>
    %436 = arith.negf %435 : vector<2x32xf32>
    %437 = math.exp %436 : vector<2x32xf32>
    %cst_88 = arith.constant 1.000000e+00 : f32
    %438 = vector.broadcast %cst_88 : f32 to vector<2x32xf32>
    %439 = arith.addf %438, %437 : vector<2x32xf32>
    %440 = arith.divf %438, %439 : vector<2x32xf32>
    %441 = arith.mulf %432, %415 : vector<2x32xf32>
    %442 = arith.mulf %426, %434 : vector<2x32xf32>
    %443 = arith.addf %441, %442 : vector<2x32xf32>
    %444 = math.tanh %443 : vector<2x32xf32>
    %445 = arith.mulf %440, %444 : vector<2x32xf32>
    %446 = vector.extract_strided_slice %247 {offsets = [14, 0], sizes = [2, 128], strides = [1, 1]} : vector<16x128xf32> to vector<2x128xf32>
    %cst_89 = arith.constant dense<0.000000e+00> : vector<2x128xf32>
    %447 = tpu.matmul %445, %242, %cst_89 {dimension_numbers = #tpu.dot_dimension_numbers<[1], [0], [0], [1], [0, 0, 1, 1], [], []>} : vector<2x32xf32>, vector<32x128xf32>, vector<2x128xf32> -> vector<2x128xf32>
    %448 = arith.addf %446, %447 : vector<2x128xf32>
    %449 = vector.extract_strided_slice %448 {offsets = [0, 0], sizes = [2, 32], strides = [1, 1]} : vector<2x128xf32> to vector<2x32xf32>
    %450 = arith.negf %449 : vector<2x32xf32>
    %451 = math.exp %450 : vector<2x32xf32>
    %cst_90 = arith.constant 1.000000e+00 : f32
    %452 = vector.broadcast %cst_90 : f32 to vector<2x32xf32>
    %453 = arith.addf %452, %451 : vector<2x32xf32>
    %454 = arith.divf %452, %453 : vector<2x32xf32>
    %455 = vector.extract_strided_slice %448 {offsets = [0, 32], sizes = [2, 32], strides = [1, 1]} : vector<2x128xf32> to vector<2x32xf32>
    %456 = arith.negf %455 : vector<2x32xf32>
    %457 = math.exp %456 : vector<2x32xf32>
    %cst_91 = arith.constant 1.000000e+00 : f32
    %458 = vector.broadcast %cst_91 : f32 to vector<2x32xf32>
    %459 = arith.addf %458, %457 : vector<2x32xf32>
    %460 = arith.divf %458, %459 : vector<2x32xf32>
    %461 = vector.extract_strided_slice %448 {offsets = [0, 64], sizes = [2, 32], strides = [1, 1]} : vector<2x128xf32> to vector<2x32xf32>
    %462 = math.tanh %461 : vector<2x32xf32>
    %463 = vector.extract_strided_slice %448 {offsets = [0, 96], sizes = [2, 32], strides = [1, 1]} : vector<2x128xf32> to vector<2x32xf32>
    %464 = arith.negf %463 : vector<2x32xf32>
    %465 = math.exp %464 : vector<2x32xf32>
    %cst_92 = arith.constant 1.000000e+00 : f32
    %466 = vector.broadcast %cst_92 : f32 to vector<2x32xf32>
    %467 = arith.addf %466, %465 : vector<2x32xf32>
    %468 = arith.divf %466, %467 : vector<2x32xf32>
    %469 = arith.mulf %460, %443 : vector<2x32xf32>
    %470 = arith.mulf %454, %462 : vector<2x32xf32>
    %471 = arith.addf %469, %470 : vector<2x32xf32>
    %472 = math.tanh %471 : vector<2x32xf32>
    %473 = arith.mulf %468, %472 : vector<2x32xf32>
    %c0_93 = arith.constant 0 : index
    %c0_94 = arith.constant 0 : index
    %474 = vector.load %arg7[%c0_93, %c0_94] : memref<32x4xf32, #tpu.memory_space<vmem>>, vector<32x4xf32>
    %cst_95 = arith.constant dense<0.000000e+00> : vector<2x4xf32>
    %475 = tpu.matmul %473, %474, %cst_95 {dimension_numbers = #tpu.dot_dimension_numbers<[1], [0], [0], [1], [0, 0, 1, 1], [], []>} : vector<2x32xf32>, vector<32x4xf32>, vector<2x4xf32> -> vector<2x4xf32>
    %c0_96 = arith.constant 0 : index
    %c0_97 = arith.constant 0 : index
    %476 = vector.load %arg8[%c0_96, %c0_97] : memref<1x4xf32, #tpu.memory_space<vmem>>, vector<1x4xf32>
    %477 = vector.broadcast %476 : vector<1x4xf32> to vector<2x4xf32>
    %478 = arith.addf %475, %477 : vector<2x4xf32>
    %c0_98 = arith.constant 0 : index
    %c0_99 = arith.constant 0 : index
    %479 = vector.load %arg9[%c0_98, %c0_99] : memref<2x4xf32, #tpu.memory_space<vmem>>, vector<2x4xf32>
    tpu.vector_store %arg9[%c0_98, %c0_99], %478 {strides = array<i32>} : memref<2x4xf32, #tpu.memory_space<vmem>>, vector<2x4xf32>,
    return
  }
}

</mosaic_0001>

<bundles_post_ra>
// kernel: lstm_model_forward.1
= control target key start
LH: loop header
LB: loop body
LE: loop exit
PB: predicated region body
PF: predicated region fallthrough
CT: control target
= control target key end

     0   :  { %14 = vsyncpa [#allocation4], 0  ;;  %s3088_s0 = inlined_call_operand.vmem [shape: f32[16,16], index: 0, kind: input, shape index: {}]   ;;  %s3089_s1 = inlined_call_operand.vmem [shape: f32[16,128], index: 1, kind: input, shape index: {}]   ;;  %s3090_s2 = inlined_call_operand.vmem [shape: f32[32,128], index: 2, kind: input, shape index: {}]   ;;  %s3091_s3 = inlined_call_operand.hbm [shape: f32[1,128], index: 3, kind: input, shape index: {}]   ;;  %s3092_s4 = inlined_call_operand.vmem [shape: f32[32,128], index: 4, kind: input, shape index: {}]   ;;  %s3093_s5 = inlined_call_operand.hbm [shape: f32[32,128], index: 5, kind: input, shape index: {}]   ;;  %s3094_s6 = inlined_call_operand.vmem [shape: f32[1,128], index: 6, kind: input, shape index: {}]   ;;  %s3095_s7 = inlined_call_operand.vmem [shape: f32[32,4], index: 7, kind: input, shape index: {}]   ;;  %s3096_s8 = inlined_call_operand.hbm [shape: f32[1,4], index: 8, kind: input, shape index: {}]   ;;  %s3097_s9 = inlined_call_operand.hbm [shape: f32[2,4], index: 9, kind: output, shape index: {}]  }
   0x1   :  { %15 = vsyncpa [#allocation7], 0 }
   0x2   :  { %16 = vsyncpa [#allocation5], 0  ;;  %s2647_s30 = smov [#allocation6]  }
   0x3   :  { %s40_s10 = sshll.u32 %s2647_s30, 4  ;;  %s41_s10 = int_to_ptr.vmem [resolvable:$true] %s40_s10 }
   0x4   :  { %s2569_s11 = scalar_lea.vmem %s41_s10, 512  ;;  %p2574_p1 = scmp.lt.s32.totalorder %s41_s10, %s41_s10 }
   0x5   :  { %p2570_p0 = scmp.ne.s32.totalorder %s41_s10, %s2569_s11  ;;  %p2575_p2 = scmp.lt.s32.totalorder %s2569_s11, %s2569_s11 }
   0x7   :  { %p2576_p3 = por %p2575_p2, %p2574_p1 }
   0x9   :  { %p2577_p4 = pnand %p2576_p3, %p2570_p0 }
   0xb   :  { %2580 = shalt.err (!%p2577_p4)
}
   0xc   :  { %s2648_s12 = smov 128   ;;  %s2649_s13 = smov 8  }
   0xd   :  { %46 = dma.hbm_to_vmem [thread:$0]  %s3093_s5, 512, %s41_s10, [#allocation7], %s2648_s12, %s2648_s12, %s2649_s13  }
   0xe   :  { %s2650_s16 = smov [#allocation3]   ;;  %s2651_s18 = smov [#allocation8]  }
   0xf   :  { %s29_s17 = sshll.u32 %s2650_s16, 4  ;;  %s57_s19 = sshll.u32 %s2651_s18, 4  ;;  %s30_s17 = int_to_ptr.vmem [resolvable:$true] %s29_s17  ;;  %s58_s19 = int_to_ptr.vmem [resolvable:$true] %s57_s19 }
  0x10   :  { %s2589_s20 = scalar_lea.vmem %s30_s17, 16  ;;  %s2593_s21 = scalar_lea.vmem %s30_s17, 32 }
  0x11   :  { %p2590_p5 = scmp.ne.s32.totalorder %s30_s17, %s2589_s20  ;;  %p2594_p6 = scmp.lt.s32.totalorder %s30_s17, %s30_s17 }
  0x12   :  { %p2595_p7 = scmp.lt.s32.totalorder %s2593_s21, %s2589_s20 }
  0x14   :  { %p2596_p8 = por %p2595_p7, %p2594_p6 }
  0x16   :  { %p2597_p9 = pnand %p2596_p8, %p2590_p5 }
  0x18   :  { %2600 = shalt.err (!%p2597_p9)
}
  0x19   :  { %32 = dma.hbm_to_vmem [thread:$0]  %s3091_s3, 16, %s30_s17, [#allocation4]  }
  0x1a   :  { %s2609_s24 = scalar_lea.vmem %s58_s19, 16  ;;  %s2613_s5 = scalar_lea.vmem %s58_s19, 32 }
  0x1b   :  { %p2610_p10 = scmp.ne.s32.totalorder %s58_s19, %s2609_s24  ;;  %p2614_p11 = scmp.lt.s32.totalorder %s58_s19, %s58_s19 }
  0x1c   :  { %p2615_p12 = scmp.lt.s32.totalorder %s2613_s5, %s2609_s24 }
  0x1e   :  { %p2616_p13 = por %p2615_p12, %p2614_p11 }
  0x20   :  { %p2617_p0 = pnand %p2616_p13, %p2610_p10 }
  0x22   :  { %2620 = shalt.err (!%p2617_p0)
}
  0x23   :  { %60 = dma.hbm_to_vmem [thread:$0]  %s3096_s8, 16, %s58_s19, [#allocation7]  }
  0x24   :  { %2641 = dma.done.wait [#allocation4], 16  }
  0x25   :  { %2642 = vsyncadd [#allocation4], 4294967280 }
  0x26   :  { %2643 = dma.done.wait [#allocation7], 528  }
  0x27   :  { %2644 = vsyncadd [#allocation7], 4294966768  ;;  %v2652_v0 = vmov 0.0   ;;  %vm2653_vm0 = vmmov 0   ;;  %v71_v1 = vld [vmem:[%s3089_s1 + $0x8] sm:$0xff]  ;;  %v2725_v2 = vld [vmem:[%s3090_s2 + $0x18] sm:$0xff] }
  0x28   :  { %2225 = vmatprep.subr.mxu1 %v2652_v0  ;;  %2233 = vmatprep.mubr.msk.f32.mxu1 %vm2653_vm0, %v2652_v0  ;;  %v70_v3 = vld [vmem:[%s3089_s1] sm:$0xff]  ;;  %v2734_v4 = vld [vmem:[%s3090_s2 + $0x10] sm:$0xff]  ;;  %vm85_vm1 = vcmask 130048   ;;  %v78_v6 = vld [vmem:[%s3088_s0 + $0x8] sm:$0xff]  ;;  %vm270_vm2 = vcmask 254976   ;;  %vm167_vm3 = vcmask 261120  }
  0x29   :  { %2218 = vmatprep.subr.mxu0 %v71_v1  ;;  %2226 = vmatpush3.msra.mxu1 %v2725_v2  ;;  %v77_v5 = vld [vmem:[%s3088_s0] sm:$0xff]  ;;  %v2747_v7 = vld [vmem:[%s3090_s2 + $0x8] sm:$0xff]  ;;  %v2085_v9 = vld [vmem:[#allocation3] ss:$0 sm:$0xff]  ;;  %s2654_s0 = smov 64   ;;  %vm379_vm4 = vcmask 257026  }
  0x2a   :  { %2219 = vmatpush3.msra.mxu0 %v71_v1  ;;  %2227 = vmatprep.subr.mxu1 %v2652_v0  ;;  %v2753_v8 = vld [vmem:[%s3090_s2] sm:$0xff]  ;;  %s2655_s2 = smov 32   ;;  %vm603_vm5 = vcmask 261126   ;;  %vm491_vm6 = vcmask 259076   ;;  %s2656_s11 = smov [#allocation9]   ;;  %vm2067_vm7 = vcmask 25600  }
  0x2b   :  { %2220 = vmatprep.subr.mxu0 %v70_v3  ;;  %2228 = vmatpush3.msra.mxu1 %v2734_v4  ;;  %s2075_s12 = sshll.u32 %s2656_s11, 4  ;;  %s2076_s12 = int_to_ptr.vmem [resolvable:$true] %s2075_s12 }
  0x2c   :  { %2221 = vmatpush3.msra.mxu0 %v70_v3  ;;  %2222 = vmatprep.mubr.msk.f32.mxu0 %vm85_vm1, %v77_v5  ;;  %p2626_p2 = scmp.lt.s32.totalorder %s2076_s12, %s2076_s12 }
  0x2d   :  { %2229 = vmatprep.subr.mxu1 %v2652_v0  ;;  %2223 = vmatmul.mubr.msk.f32.vlgmr.msra.gmra.mxu0 %vm85_vm1, %v78_v6 }
  0x2e   :  { %2230 = vmatpush3.msra.mxu1 %v2747_v7  ;;  %2236 = vmatprep.subr.mxu0 %v2652_v0 }
  0x2f   :  { %2231 = vmatprep.subr.mxu1 %v2652_v0  ;;  %2237 = vmatpush3.msra.mxu0 %v2725_v2 }
  0x30   :  { %2232 = vmatpush3.msra.mxu1 %v2753_v8  ;;  %2238 = vmatprep.subr.mxu0 %v2652_v0 }
  0x31   :  { %2234 = vmatmul.mubr.f32.vlgmr.msra.gmra.mxu1 %v2652_v0  ;;  %2239 = vmatpush3.msra.mxu0 %v2734_v4 }
  0x32   :  { %2240 = vmatprep.subr.mxu0 %v2652_v0  ;;  %2244 = vmatprep.mubr.msk.f32.mxu0 %vm2653_vm0, %v2652_v0 }
  0x33   :  { %2241 = vmatpush3.msra.mxu0 %v2747_v7  ;;  %2247 = vmatprep.subr.mxu1 %v2652_v0 }
  0x34   :  { %2242 = vmatprep.subr.mxu0 %v2652_v0  ;;  %2248 = vmatpush3.msra.mxu1 %v2725_v2 }
  0x35   :  { %2243 = vmatpush3.msra.mxu0 %v2753_v8  ;;  %2249 = vmatprep.subr.mxu1 %v2652_v0 }
  0x36   :  { %2250 = vmatpush3.msra.mxu1 %v2734_v4  ;;  %2255 = vmatprep.mubr.msk.f32.mxu1 %vm2653_vm0, %v2652_v0 }
  0x37   :  { %2251 = vmatprep.subr.mxu1 %v2652_v0  ;;  %2258 = vmatprep.subr.mxu0 %v2652_v0 }
  0x38   :  { %2252 = vmatpush3.msra.mxu1 %v2747_v7 }
  0x39   :  { %2253 = vmatprep.subr.mxu1 %v2652_v0 }
  0x3a   :  { %2254 = vmatpush3.msra.mxu1 %v2753_v8 }
  0x3b   :  { %2269 = vmatprep.subr.mxu1 %v2652_v0 }
  0xed   :  { %v2224_v10 = vpop.f32.mrf.mxu0 }
  0xee   :  { %v2781_v11 = vadd.f32 %v2224_v10, %v2085_v9 }
  0xef   :  { %v158_v12 = vpop.f32.mrf.mxu0 }
  0xf0   :  { %v2783_v13 = vadd.f32 %v2085_v9, %v158_v12 }
  0xf1   :  { %v237_v14 = vpop.f32.mrf.mxu1 }
  0xf2   :  { %v241_v15 = vadd.f32 %v237_v14, %v2783_v13 }
  0xf3   :  { %v2235_v16 = vpop.f32.mrf.mxu1 }
  0xf4   :  { %2433 = vtanh.f32 %v241_v15  ;;  %v2088_v18 = vmul.f32 -1.442695, %v241_v15 }
  0xf6   :  { %2435 = vpow2.f32 %v2088_v18 }
 0x101   :  { %v2434_v17 = vpop.eup %2433 }
 0x102   :  { %251 = vrot.lane.b32.xlu0 %v2434_v17, %s2654_s0 }
 0x103   :  { %v2436_v19 = vpop.eup %2435 }
 0x104   :  { %v245_v20 = vadd.f32 1.0, %v2436_v19 }
 0x106   :  { %2437 = vrcp.f32 %v245_v20 }
 0x113   :  { %v2438_v21 = vpop.eup %2437 }
 0x114   :  { %v249_v24 = vmul.f32 0.0, %v2438_v21 }
 0x174   :  { %v252_v22 = vpop.permute.xlu0 %251 }
 0x175   :  { %v254_v23 = vmul.f32 %v2438_v21, %v252_v22 }
 0x177   :  { %256 = vrot.lane.b32.xlu0 %v254_v23, %s2655_s2 }
 0x1e9   :  { %v257_v25 = vpop.permute.xlu0 %256 }
 0x1ea   :  { %v259_v26 = vadd.f32 %v257_v25, %v249_v24 }
 0x1ec   :  { %2439 = vtanh.f32 %v259_v26  ;;  %v356_v42 = vrot.slane %v259_v26, 6 }
 0x1f9   :  { %v2440_v27 = vpop.eup %2439 }
 0x1fa   :  { %262 = vrot.lane.b32.xlu1 %v2440_v27, %s2654_s0 }
 0x26c   :  { %v263_v28 = vpop.permute.xlu1 %262 }
 0x26d   :  { %v265_v29 = vmul.f32 %v2438_v21, %v263_v28 }
 0x26f   :  { %267 = vrot.lane.b32.xlu1 %v265_v29, %s2655_s2 }
 0x2e1   :  { %v268_v30 = vpop.permute.xlu1 %267 }
 0x2e2   :  { %271 = vst.msk [vmem:[#allocation2] sm:$0x3] %vm270_vm2, %v268_v30  ;;  %2245 = vmatmul.mubr.msk.f32.vlgmr.msra.gmra.mxu0 %vm167_vm3, %v268_v30 }
 0x2e3   :  { %2259 = vmatpush3.msra.mxu0 %v2725_v2  ;;  %2266 = vmatprep.mubr.msk.f32.mxu0 %vm2653_vm0, %v2652_v0 }
 0x2e4   :  { %2260 = vmatprep.subr.mxu0 %v2652_v0 }
 0x2e5   :  { %2261 = vmatpush3.msra.mxu0 %v2734_v4 }
 0x2e6   :  { %2262 = vmatprep.subr.mxu0 %v2652_v0 }
 0x2e7   :  { %2263 = vmatpush3.msra.mxu0 %v2747_v7 }
 0x2e8   :  { %2264 = vmatprep.subr.mxu0 %v2652_v0 }
 0x2e9   :  { %2265 = vmatpush3.msra.mxu0 %v2753_v8 }
 0x2ea   :  { %2280 = vmatprep.subr.mxu0 %v2652_v0 }
 0x3a2   :  { %v340_v31 = vpop.f32.mrf.mxu0 }
 0x3a3   :  { %v345_v32 = vrot.slane %v340_v31, 6 }
 0x3a4   :  { %v2246_v33 = vpop.f32.mrf.mxu0 }
 0x3a5   :  { %v347_v34 = vadd.f32 %v345_v32, %v2783_v13 }
 0x3a7   :  { %2441 = vtanh.f32 %v347_v34  ;;  %v2090_v36 = vmul.f32 -1.442695, %v347_v34 }
 0x3a9   :  { %2443 = vpow2.f32 %v2090_v36 }
 0x3b4   :  { %v2442_v35 = vpop.eup %2441 }
 0x3b5   :  { %360 = vrot.lane.b32.xlu0 %v2442_v35, %s2654_s0 }
 0x3b6   :  { %v2444_v37 = vpop.eup %2443 }
 0x3b7   :  { %v351_v38 = vadd.f32 1.0, %v2444_v37 }
 0x3b9   :  { %2445 = vrcp.f32 %v351_v38 }
 0x3c6   :  { %v2446_v39 = vpop.eup %2445 }
 0x3c7   :  { %v358_v43 = vmul.f32 %v2446_v39, %v356_v42 }
 0x427   :  { %v361_v40 = vpop.permute.xlu0 %360 }
 0x428   :  { %v363_v41 = vmul.f32 %v2446_v39, %v361_v40 }
 0x42a   :  { %365 = vrot.lane.b32.xlu1 %v363_v41, %s2655_s2 }
 0x49c   :  { %v366_v44 = vpop.permute.xlu1 %365 }
 0x49d   :  { %v368_v45 = vadd.f32 %v366_v44, %v358_v43 }
 0x49f   :  { %2447 = vtanh.f32 %v368_v45  ;;  %v468_v62 = vrot.slane %v368_v45, 6 }
 0x4ac   :  { %v2448_v46 = vpop.eup %2447 }
 0x4ad   :  { %371 = vrot.lane.b32.xlu0 %v2448_v46, %s2654_s0 }
 0x51f   :  { %v372_v47 = vpop.permute.xlu0 %371 }
 0x520   :  { %v2806_v48 = vmul.f32 %v2446_v39, %v372_v47 }
 0x522   :  { %v381_v49 = vrot.slane %v2806_v48, 2 }
 0x524   :  { %382 = vrot.lane.b32.xlu1 %v381_v49, %s2655_s2 }
 0x596   :  { %v383_v50 = vpop.permute.xlu1 %382 }
 0x597   :  { %2256 = vmatmul.mubr.msk.f32.vlgmr.msra.gmra.mxu1 %vm167_vm3, %v383_v50 }
 0x598   :  { %2270 = vmatpush3.msra.mxu1 %v2725_v2  ;;  %2277 = vmatprep.mubr.msk.f32.mxu1 %vm2653_vm0, %v2652_v0 }
 0x599   :  { %2271 = vmatprep.subr.mxu1 %v2652_v0 }
 0x59a   :  { %2272 = vmatpush3.msra.mxu1 %v2734_v4 }
 0x59b   :  { %2273 = vmatprep.subr.mxu1 %v2652_v0 }
 0x59c   :  { %2274 = vmatpush3.msra.mxu1 %v2747_v7 }
 0x59d   :  { %2275 = vmatprep.subr.mxu1 %v2652_v0 }
 0x59e   :  { %2276 = vmatpush3.msra.mxu1 %v2753_v8 }
 0x59f   :  { %2291 = vmatprep.subr.mxu1 %v2652_v0 }
 0x657   :  { %v452_v51 = vpop.f32.mrf.mxu1 }
 0x658   :  { %v457_v52 = vrot.slane %v452_v51, 4 }
 0x659   :  { %v2257_v53 = vpop.f32.mrf.mxu1 }
 0x65a   :  { %v459_v54 = vadd.f32 %v457_v52, %v2783_v13 }
 0x65c   :  { %2449 = vtanh.f32 %v459_v54  ;;  %v2092_v56 = vmul.f32 -1.442695, %v459_v54 }
 0x65e   :  { %2451 = vpow2.f32 %v2092_v56 }
 0x669   :  { %v2450_v55 = vpop.eup %2449 }
 0x66a   :  { %472 = vrot.lane.b32.xlu0 %v2450_v55, %s2654_s0 }
 0x66b   :  { %v2452_v57 = vpop.eup %2451 }
 0x66c   :  { %v463_v58 = vadd.f32 1.0, %v2452_v57 }
 0x66e   :  { %2453 = vrcp.f32 %v463_v58 }
 0x67b   :  { %v2454_v59 = vpop.eup %2453 }
 0x67c   :  { %v470_v63 = vmul.f32 %v2454_v59, %v468_v62 }
 0x6dc   :  { %v473_v60 = vpop.permute.xlu0 %472 }
 0x6dd   :  { %v475_v61 = vmul.f32 %v2454_v59, %v473_v60 }
 0x6df   :  { %477 = vrot.lane.b32.xlu1 %v475_v61, %s2655_s2 }
 0x751   :  { %v478_v1 = vpop.permute.xlu1 %477 }
 0x752   :  { %v480_v3 = vadd.f32 %v478_v1, %v470_v63 }
 0x754   :  { %2455 = vtanh.f32 %v480_v3  ;;  %v580_v25 = vrot.slane %v480_v3, 6 }
 0x761   :  { %v2456_v5 = vpop.eup %2455 }
 0x762   :  { %483 = vrot.lane.b32.xlu0 %v2456_v5, %s2654_s0 }
 0x7d4   :  { %v484_v6 = vpop.permute.xlu0 %483 }
 0x7d5   :  { %v2825_v9 = vmul.f32 %v2454_v59, %v484_v6 }
 0x7d7   :  { %v493_v10 = vrot.slane %v2825_v9, 4 }
 0x7d9   :  { %494 = vrot.lane.b32.xlu1 %v493_v10, %s2655_s2 }
 0x84b   :  { %v495_v12 = vpop.permute.xlu1 %494 }
 0x84c   :  { %2267 = vmatmul.mubr.msk.f32.vlgmr.msra.gmra.mxu0 %vm167_vm3, %v495_v12 }
 0x84d   :  { %2281 = vmatpush3.msra.mxu0 %v2725_v2  ;;  %2288 = vmatprep.mubr.msk.f32.mxu0 %vm2653_vm0, %v2652_v0 }
 0x84e   :  { %2282 = vmatprep.subr.mxu0 %v2652_v0 }
 0x84f   :  { %2283 = vmatpush3.msra.mxu0 %v2734_v4 }
 0x850   :  { %2284 = vmatprep.subr.mxu0 %v2652_v0 }
 0x851   :  { %2285 = vmatpush3.msra.mxu0 %v2747_v7 }
 0x852   :  { %2286 = vmatprep.subr.mxu0 %v2652_v0 }
 0x853   :  { %2287 = vmatpush3.msra.mxu0 %v2753_v8 }
 0x854   :  { %2302 = vmatprep.subr.mxu0 %v2652_v0 }
 0x90c   :  { %v564_v14 = vpop.f32.mrf.mxu0 }
 0x90d   :  { %v569_v15 = vrot.slane %v564_v14, 2 }
 0x90e   :  { %v2268_v16 = vpop.f32.mrf.mxu0 }
 0x90f   :  { %v571_v17 = vadd.f32 %v569_v15, %v2783_v13 }
 0x911   :  { %2457 = vtanh.f32 %v571_v17  ;;  %v2094_v19 = vmul.f32 -1.442695, %v571_v17 }
 0x913   :  { %2459 = vpow2.f32 %v2094_v19 }
 0x91e   :  { %v2458_v18 = vpop.eup %2457 }
 0x91f   :  { %584 = vrot.lane.b32.xlu0 %v2458_v18, %s2654_s0 }
 0x920   :  { %v2460_v20 = vpop.eup %2459 }
 0x921   :  { %v575_v21 = vadd.f32 1.0, %v2460_v20 }
 0x923   :  { %2461 = vrcp.f32 %v575_v21 }
 0x930   :  { %v2462_v22 = vpop.eup %2461 }
 0x931   :  { %v582_v26 = vmul.f32 %v2462_v22, %v580_v25 }
 0x991   :  { %v585_v23 = vpop.permute.xlu0 %584 }
 0x992   :  { %v587_v24 = vmul.f32 %v2462_v22, %v585_v23 }
 0x994   :  { %589 = vrot.lane.b32.xlu1 %v587_v24, %s2655_s2 }
 0xa06   :  { %v590_v27 = vpop.permute.xlu1 %589 }
 0xa07   :  { %v592_v28 = vadd.f32 %v590_v27, %v582_v26 }
 0xa09   :  { %2463 = vtanh.f32 %v592_v28  ;;  %v689_v43 = vrot.slane %v592_v28, 6 }
 0xa16   :  { %v2464_v13 = vpop.eup %2463 }
 0xa17   :  { %595 = vrot.lane.b32.xlu0 %v2464_v13, %s2654_s0 }
 0xa89   :  { %v596_v29 = vpop.permute.xlu0 %595 }
 0xa8a   :  { %v2844_v30 = vmul.f32 %v2462_v22, %v596_v29 }
 0xa8c   :  { %v605_v31 = vrot.slane %v2844_v30, 6 }
 0xa8e   :  { %606 = vrot.lane.b32.xlu1 %v605_v31, %s2655_s2 }
 0xb00   :  { %v607_v32 = vpop.permute.xlu1 %606 }
 0xb01   :  { %2278 = vmatmul.mubr.msk.f32.vlgmr.msra.gmra.mxu1 %vm167_vm3, %v607_v32 }
 0xb02   :  { %2292 = vmatpush3.msra.mxu1 %v2725_v2  ;;  %2299 = vmatprep.mubr.msk.f32.mxu1 %vm2653_vm0, %v2652_v0 }
 0xb03   :  { %2293 = vmatprep.subr.mxu1 %v2652_v0 }
 0xb04   :  { %2294 = vmatpush3.msra.mxu1 %v2734_v4 }
 0xb05   :  { %2295 = vmatprep.subr.mxu1 %v2652_v0 }
 0xb06   :  { %2296 = vmatpush3.msra.mxu1 %v2747_v7 }
 0xb07   :  { %2297 = vmatprep.subr.mxu1 %v2652_v0 }
 0xb08   :  { %2298 = vmatpush3.msra.mxu1 %v2753_v8 }
 0xbc1   :  { %v676_v33 = vpop.f32.mrf.mxu1 }
 0xbc2   :  { %v680_v34 = vadd.f32 %v676_v33, %v2781_v11 }
 0xbc3   :  { %v2279_v35 = vpop.f32.mrf.mxu1 }
 0xbc4   :  { %2465 = vtanh.f32 %v680_v34  ;;  %v2096_v37 = vmul.f32 -1.442695, %v680_v34 }
 0xbc6   :  { %2467 = vpow2.f32 %v2096_v37 }
 0xbd1   :  { %v2466_v36 = vpop.eup %2465 }
 0xbd2   :  { %693 = vrot.lane.b32.xlu0 %v2466_v36, %s2654_s0 }
 0xbd3   :  { %v2468_v38 = vpop.eup %2467 }
 0xbd4   :  { %v684_v39 = vadd.f32 1.0, %v2468_v38 }
 0xbd6   :  { %2469 = vrcp.f32 %v684_v39 }
 0xbe3   :  { %v2470_v40 = vpop.eup %2469 }
 0xbe4   :  { %v691_v44 = vmul.f32 %v2470_v40, %v689_v43 }
 0xc44   :  { %v694_v41 = vpop.permute.xlu0 %693 }
 0xc45   :  { %v696_v42 = vmul.f32 %v2470_v40, %v694_v41 }
 0xc47   :  { %698 = vrot.lane.b32.xlu1 %v696_v42, %s2655_s2 }
 0xcb9   :  { %v699_v45 = vpop.permute.xlu1 %698 }
 0xcba   :  { %v701_v46 = vadd.f32 %v699_v45, %v691_v44 }
 0xcbc   :  { %2471 = vtanh.f32 %v701_v46 }
 0xcc9   :  { %v2472_v47 = vpop.eup %2471 }
 0xcca   :  { %704 = vrot.lane.b32.xlu0 %v2472_v47, %s2654_s0 }
 0xd3c   :  { %v705_v49 = vpop.permute.xlu0 %704 }
 0xd3d   :  { %v707_v50 = vmul.f32 %v2470_v40, %v705_v49  ;;  %v1046_v49 = vld [vmem:[%s3092_s4 + $0x18] sm:$0xff] }
 0xd3e   :  { %2313 = vmatprep.subr.mxu1 %v1046_v49 }
 0xd3f   :  { %709 = vrot.lane.b32.xlu1 %v707_v50, %s2655_s2  ;;  %v1045_v50 = vld [vmem:[%s3092_s4 + $0x10] sm:$0xff] }
 0xdb1   :  { %v710_v51 = vpop.permute.xlu1 %709 }
 0xdb2   :  { %712 = vst.msk [vmem:[#allocation2 + $0x8] sm:$0x3] %vm270_vm2, %v710_v51  ;;  %2289 = vmatmul.mubr.msk.f32.vlgmr.msra.gmra.mxu0 %vm167_vm3, %v710_v51  ;;  %v2914_v51 = vld [vmem:[#allocation6 + $0x18] sm:$0xff] }
 0xdb3   :  { %2303 = vmatpush3.msra.mxu0 %v2725_v2  ;;  %2310 = vmatprep.mubr.msk.f32.mxu0 %vm2653_vm0, %v2652_v0 }
 0xdb4   :  { %2304 = vmatprep.subr.mxu0 %v2652_v0 }
 0xdb5   :  { %2305 = vmatpush3.msra.mxu0 %v2734_v4 }
 0xdb6   :  { %2306 = vmatprep.subr.mxu0 %v2652_v0 }
 0xdb7   :  { %2307 = vmatpush3.msra.mxu0 %v2747_v7 }
 0xdb8   :  { %2308 = vmatprep.subr.mxu0 %v2652_v0 }
 0xdb9   :  { %2309 = vmatpush3.msra.mxu0 %v2753_v8  ;;  %v797_v8 = vrot.slane %v701_v46, 6 }
 0xdba   :  { %2324 = vmatprep.subr.mxu0 %v2652_v0 }
 0xe72   :  { %v781_v52 = vpop.f32.mrf.mxu0 }
 0xe73   :  { %v786_v53 = vrot.slane %v781_v52, 6  ;;  %v2917_v52 = vld [vmem:[#allocation6 + $0x10] sm:$0xff] }
 0xe74   :  { %v2290_v2 = vpop.f32.mrf.mxu0 }
 0xe75   :  { %v788_v54 = vadd.f32 %v786_v53, %v2781_v11  ;;  %v2923_v53 = vld [vmem:[#allocation6 + $0x8] sm:$0xff] }
 0xe76   :  { %v1043_v2 = vld [vmem:[%s3092_s4] sm:$0xff] }
 0xe77   :  { %2473 = vtanh.f32 %v788_v54  ;;  %v2098_v4 = vmul.f32 -1.442695, %v788_v54  ;;  %v2932_v54 = vld [vmem:[#allocation6] sm:$0xff] }
 0xe79   :  { %2475 = vpow2.f32 %v2098_v4 }
 0xe84   :  { %v2474_v55 = vpop.eup %2473 }
 0xe85   :  { %801 = vrot.lane.b32.xlu0 %v2474_v55, %s2654_s0 }
 0xe86   :  { %v2476_v56 = vpop.eup %2475 }
 0xe87   :  { %v792_v57 = vadd.f32 1.0, %v2476_v56 }
 0xe89   :  { %2477 = vrcp.f32 %v792_v57 }
 0xe96   :  { %v2478_v7 = vpop.eup %2477 }
 0xe97   :  { %v799_v60 = vmul.f32 %v2478_v7, %v797_v8 }
 0xef7   :  { %v802_v58 = vpop.permute.xlu0 %801 }
 0xef8   :  { %v804_v59 = vmul.f32 %v2478_v7, %v802_v58 }
 0xefa   :  { %806 = vrot.lane.b32.xlu1 %v804_v59, %s2655_s2 }
 0xf6c   :  { %v807_v61 = vpop.permute.xlu1 %806 }
 0xf6d   :  { %v809_v62 = vadd.f32 %v807_v61, %v799_v60  ;;  %v2103_v61 = vld [vmem:[%s3094_s6] ss:$0 sm:$0xff] }
 0xf6f   :  { %2479 = vtanh.f32 %v809_v62  ;;  %v908_v23 = vrot.slane %v809_v62, 6 }
 0xf7c   :  { %v2480_v63 = vpop.eup %2479 }
 0xf7d   :  { %812 = vrot.lane.b32.xlu0 %v2480_v63, %s2654_s0 }
 0xfef   :  { %v813_v1 = vpop.permute.xlu0 %812 }
 0xff0   :  { %v2879_v3 = vmul.f32 %v2478_v7, %v813_v1 }
 0xff2   :  { %v821_v5 = vrot.slane %v2879_v3, 2 }
 0xff4   :  { %822 = vrot.lane.b32.xlu1 %v821_v5, %s2655_s2 }
0x1066   :  { %v823_v6 = vpop.permute.xlu1 %822 }
0x1067   :  { %2300 = vmatmul.mubr.msk.f32.vlgmr.msra.gmra.mxu1 %vm167_vm3, %v823_v6 }
0x1068   :  { %2314 = vmatpush3.msra.mxu1 %v1046_v49 }
0x1069   :  { %2315 = vmatprep.subr.mxu1 %v1045_v50 }
0x106a   :  { %2316 = vmatpush3.msra.mxu1 %v1045_v50 }
0x1127   :  { %v892_v10 = vpop.f32.mrf.mxu1 }
0x1128   :  { %v897_v12 = vrot.slane %v892_v10, 4 }
0x1129   :  { %v2301_v14 = vpop.f32.mrf.mxu1 }
0x112a   :  { %v899_v15 = vadd.f32 %v897_v12, %v2781_v11 }
0x112c   :  { %2481 = vtanh.f32 %v899_v15  ;;  %v2100_v17 = vmul.f32 -1.442695, %v899_v15 }
0x112e   :  { %2483 = vpow2.f32 %v2100_v17 }
0x1139   :  { %v2482_v16 = vpop.eup %2481 }
0x113a   :  { %912 = vrot.lane.b32.xlu0 %v2482_v16, %s2654_s0 }
0x113b   :  { %v2484_v18 = vpop.eup %2483 }
0x113c   :  { %v903_v19 = vadd.f32 1.0, %v2484_v18 }
0x113e   :  { %2485 = vrcp.f32 %v903_v19 }
0x114b   :  { %v2486_v20 = vpop.eup %2485 }
0x114c   :  { %v910_v24 = vmul.f32 %v2486_v20, %v908_v23 }
0x11ac   :  { %v913_v21 = vpop.permute.xlu0 %912 }
0x11ad   :  { %v915_v22 = vmul.f32 %v2486_v20, %v913_v21 }
0x11af   :  { %917 = vrot.lane.b32.xlu1 %v915_v22, %s2655_s2 }
0x1221   :  { %v918_v25 = vpop.permute.xlu1 %917 }
0x1222   :  { %v920_v26 = vadd.f32 %v918_v25, %v910_v24 }
0x1224   :  { %2487 = vtanh.f32 %v920_v26 }
0x1231   :  { %v2488_v27 = vpop.eup %2487 }
0x1232   :  { %923 = vrot.lane.b32.xlu0 %v2488_v27, %s2654_s0 }
0x12a4   :  { %v924_v28 = vpop.permute.xlu0 %923 }
0x12a5   :  { %v926_v13 = vmul.f32 %v2486_v20, %v924_v28 }
0x12a7   :  { %v932_v29 = vrot.slane %v926_v13, 4 }
0x12a9   :  { %933 = vrot.lane.b32.xlu1 %v932_v29, %s2655_s2 }
0x131b   :  { %v934_v31 = vpop.permute.xlu1 %933 }
0x131c   :  { %2311 = vmatmul.mubr.msk.f32.vlgmr.msra.gmra.mxu0 %vm167_vm3, %v934_v31 }
0x131d   :  { %2332 = vmatprep.mubr.msk.f32.mxu0 %vm2653_vm0, %v2652_v0  ;;  %2325 = vmatpush3.msra.mxu0 %v2914_v51 }
0x131e   :  { %2326 = vmatprep.subr.mxu0 %v2652_v0 }
0x131f   :  { %2327 = vmatpush3.msra.mxu0 %v2917_v52 }
0x1320   :  { %2328 = vmatprep.subr.mxu0 %v2652_v0 }
0x1321   :  { %2329 = vmatpush3.msra.mxu0 %v2923_v53 }
0x1322   :  { %2330 = vmatprep.subr.mxu0 %v2652_v0 }
0x1323   :  { %2331 = vmatpush3.msra.mxu0 %v2932_v54 }
0x1324   :  { %2333 = vmatmul.mubr.f32.vlgmr.msra.gmra.mxu0 %v2652_v0  ;;  %2346 = vmatprep.subr.mxu0 %v2652_v0 }
0x1325   :  { %2347 = vmatpush3.msra.mxu0 %v2914_v51  ;;  %2354 = vmatprep.mubr.msk.f32.mxu0 %vm2653_vm0, %v2652_v0 }
0x1326   :  { %2348 = vmatprep.subr.mxu0 %v2652_v0 }
0x1327   :  { %2349 = vmatpush3.msra.mxu0 %v2917_v52 }
0x1328   :  { %2350 = vmatprep.subr.mxu0 %v2652_v0 }
0x1329   :  { %2351 = vmatpush3.msra.mxu0 %v2923_v53 }
0x132a   :  { %2352 = vmatprep.subr.mxu0 %v2652_v0 }
0x132b   :  { %2353 = vmatpush3.msra.mxu0 %v2932_v54 }
0x132c   :  { %2368 = vmatprep.subr.mxu0 %v2652_v0 }
0x13dc   :  { %v1003_v32 = vpop.f32.mrf.mxu0 }
0x13dd   :  { %v1008_v33 = vrot.slane %v1003_v32, 2 }
0x13de   :  { %v2312_v34 = vpop.f32.mrf.mxu0 }
0x13df   :  { %v1010_v35 = vadd.f32 %v1008_v33, %v2781_v11  ;;  %v1019_v11 = vrot.slane %v920_v26, 6 }
0x13e1   :  { %2489 = vtanh.f32 %v1010_v35  ;;  %v2102_v37 = vmul.f32 -1.442695, %v1010_v35 }
0x13e3   :  { %2491 = vpow2.f32 %v2102_v37 }
0x13e4   :  { %v1207_v8 = vpop.f32.mrf.mxu0 }
0x13e6   :  { %v2334_v60 = vpop.f32.mrf.mxu0 }
0x13ee   :  { %v2490_v36 = vpop.eup %2489 }
0x13ef   :  { %1023 = vrot.lane.b32.xlu0 %v2490_v36, %s2654_s0 }
0x13f0   :  { %v2492_v38 = vpop.eup %2491 }
0x13f1   :  { %v1014_v39 = vadd.f32 1.0, %v2492_v38 }
0x13f3   :  { %2493 = vrcp.f32 %v1014_v39 }
0x1400   :  { %v2494_v40 = vpop.eup %2493 }
0x1401   :  { %v1021_v43 = vmul.f32 %v2494_v40, %v1019_v11 }
0x1461   :  { %v1024_v41 = vpop.permute.xlu0 %1023 }
0x1462   :  { %v1026_v42 = vmul.f32 %v2494_v40, %v1024_v41 }
0x1464   :  { %1028 = vrot.lane.b32.xlu1 %v1026_v42, %s2655_s2 }
0x1468   :  { %376 = vrot.lane.b32.xlu1 %v2806_v48, %s2655_s2 }
0x146c   :  { %600 = vrot.lane.b32.xlu1 %v2844_v30, %s2655_s2 }
0x1470   :  { %928 = vrot.lane.b32.xlu1 %v926_v13, %s2655_s2 }
0x14d6   :  { %v1029_v44 = vpop.permute.xlu1 %1028 }
0x14d7   :  { %v1031_v45 = vadd.f32 %v1029_v44, %v1021_v43 }
0x14d9   :  { %2495 = vtanh.f32 %v1031_v45 }
0x14da   :  { %v377_v46 = vpop.permute.xlu1 %376 }
0x14db   :  { %380 = vst.msk [vmem:[#allocation2] sm:$0xc] %vm379_vm4, %v377_v46 }
0x14de   :  { %v601_v47 = vpop.permute.xlu1 %600 }
0x14df   :  { %604 = vst.msk [vmem:[#allocation2] sm:$0xc0] %vm603_vm5, %v601_v47 }
0x14e2   :  { %v929_v48 = vpop.permute.xlu1 %928 }
0x14e3   :  { %931 = vst.msk [vmem:[#allocation2 + $0x8] sm:$0x30] %vm491_vm6, %v929_v48 }
0x14e6   :  { %v2496_v30 = vpop.eup %2495 }
0x14e7   :  { %1034 = vrot.lane.b32.xlu0 %v2496_v30, %s2654_s0 }
0x14eb   :  { %488 = vrot.lane.b32.xlu0 %v2825_v9, %s2655_s2  ;;  %v1044_v9 = vld [vmem:[%s3092_s4 + $0x8] sm:$0xff] }
0x14ec   :  { %2317 = vmatprep.subr.mxu1 %v1044_v9 }
0x14ed   :  { %2318 = vmatpush3.msra.mxu1 %v1044_v9 }
0x14ee   :  { %2319 = vmatprep.subr.mxu1 %v1043_v2 }
0x14ef   :  { %817 = vrot.lane.b32.xlu0 %v2879_v3, %s2655_s2  ;;  %2320 = vmatpush3.msra.mxu1 %v1043_v2 }
0x14f0   :  { %2335 = vmatprep.subr.mxu1 %v2652_v0 }
0x1559   :  { %v1035_v55 = vpop.permute.xlu0 %1034 }
0x155a   :  { %v1037_v4 = vmul.f32 %v2494_v40, %v1035_v55 }
0x155c   :  { %1039 = vrot.lane.b32.xlu0 %v1037_v4, %s2655_s2 }
0x155d   :  { %v489_v56 = vpop.permute.xlu0 %488 }
0x155e   :  { %492 = vst.msk [vmem:[#allocation2] sm:$0x30] %vm491_vm6, %v489_v56 }
0x1561   :  { %v818_v57 = vpop.permute.xlu0 %817 }
0x1562   :  { %820 = vst.msk [vmem:[#allocation2 + $0x8] sm:$0xc] %vm379_vm4, %v818_v57 }
0x1565   :  { %v1052_v7 = vld [vmem:[#allocation2] sm:$0xff] }
0x1566   :  { %2321 = vmatprep.mubr.msk.f32.mxu1 %vm167_vm3, %v1052_v7 }
0x15ce   :  { %v1040_v58 = vpop.permute.xlu0 %1039 }
0x15cf   :  { %1042 = vst.msk [vmem:[#allocation2 + $0x8] sm:$0xc0] %vm603_vm5, %v1040_v58 }
0x15d6   :  { %v1053_v59 = vld [vmem:[#allocation2 + $0x8] sm:$0xff] }
0x15d7   :  { %2322 = vmatmul.mubr.msk.f32.vlgmr.msra.gmra.mxu1 %vm167_vm3, %v1053_v59 }
0x15d8   :  { %2336 = vmatpush3.msra.mxu1 %v2914_v51  ;;  %2343 = vmatprep.mubr.msk.f32.mxu1 %vm2653_vm0, %v2652_v0 }
0x15d9   :  { %2337 = vmatprep.subr.mxu1 %v2652_v0 }
0x15da   :  { %2338 = vmatpush3.msra.mxu1 %v2917_v52 }
0x15db   :  { %2339 = vmatprep.subr.mxu1 %v2652_v0 }
0x15dc   :  { %2340 = vmatpush3.msra.mxu1 %v2923_v53 }
0x15dd   :  { %2341 = vmatprep.subr.mxu1 %v2652_v0 }
0x15de   :  { %2342 = vmatpush3.msra.mxu1 %v2932_v54 }
0x15df   :  { %2357 = vmatprep.subr.mxu1 %v2652_v0 }
0x1697   :  { %v2323_v62 = vpop.f32.mrf.mxu1 }
0x1698   :  { %v2967_v63 = vadd.f32 %v2323_v62, %v2103_v61 }
0x1699   :  { %v1132_v1 = vpop.f32.mrf.mxu1 }
0x169a   :  { %v2969_v3 = vadd.f32 %v2103_v61, %v1132_v1 }
0x169c   :  { %v1211_v5 = vadd.f32 %v1207_v8, %v2969_v3 }
0x169e   :  { %2497 = vtanh.f32 %v1211_v5  ;;  %v2106_v10 = vmul.f32 -1.442695, %v1211_v5 }
0x16a0   :  { %2499 = vpow2.f32 %v2106_v10 }
0x16ab   :  { %v2498_v6 = vpop.eup %2497 }
0x16ac   :  { %1221 = vrot.lane.b32.xlu1 %v2498_v6, %s2654_s0 }
0x16ad   :  { %v2500_v12 = vpop.eup %2499 }
0x16ae   :  { %v1215_v14 = vadd.f32 1.0, %v2500_v12 }
0x16b0   :  { %2501 = vrcp.f32 %v1215_v14 }
0x16bd   :  { %v2502_v15 = vpop.eup %2501 }
0x16be   :  { %v1219_v18 = vmul.f32 0.0, %v2502_v15 }
0x171e   :  { %v1222_v16 = vpop.permute.xlu1 %1221 }
0x171f   :  { %v1224_v17 = vmul.f32 %v2502_v15, %v1222_v16 }
0x1721   :  { %1226 = vrot.lane.b32.xlu0 %v1224_v17, %s2655_s2 }
0x1793   :  { %v1227_v19 = vpop.permute.xlu0 %1226 }
0x1794   :  { %v1229_v20 = vadd.f32 %v1227_v19, %v1219_v18 }
0x1796   :  { %2503 = vtanh.f32 %v1229_v20  ;;  %v1323_v36 = vrot.slane %v1229_v20, 6 }
0x17a3   :  { %v2504_v21 = vpop.eup %2503 }
0x17a4   :  { %1232 = vrot.lane.b32.xlu1 %v2504_v21, %s2654_s0 }
0x1816   :  { %v1233_v22 = vpop.permute.xlu1 %1232 }
0x1817   :  { %v1235_v23 = vmul.f32 %v2502_v15, %v1233_v22 }
0x1819   :  { %1237 = vrot.lane.b32.xlu0 %v1235_v23, %s2655_s2 }
0x188b   :  { %v1238_v24 = vpop.permute.xlu0 %1237 }
0x188c   :  { %2344 = vmatmul.mubr.msk.f32.vlgmr.msra.gmra.mxu1 %vm167_vm3, %v1238_v24 }
0x188d   :  { %2358 = vmatpush3.msra.mxu1 %v2914_v51  ;;  %2365 = vmatprep.mubr.msk.f32.mxu1 %vm2653_vm0, %v2652_v0 }
0x188e   :  { %2359 = vmatprep.subr.mxu1 %v2652_v0 }
0x188f   :  { %2360 = vmatpush3.msra.mxu1 %v2917_v52 }
0x1890   :  { %2361 = vmatprep.subr.mxu1 %v2652_v0 }
0x1891   :  { %2362 = vmatpush3.msra.mxu1 %v2923_v53 }
0x1892   :  { %2363 = vmatprep.subr.mxu1 %v2652_v0 }
0x1893   :  { %2364 = vmatpush3.msra.mxu1 %v2932_v54 }
0x1894   :  { %2379 = vmatprep.subr.mxu1 %v2652_v0 }
0x194c   :  { %v1307_v25 = vpop.f32.mrf.mxu1 }
0x194d   :  { %v1312_v26 = vrot.slane %v1307_v25, 6 }
0x194e   :  { %v2345_v27 = vpop.f32.mrf.mxu1 }
0x194f   :  { %v1314_v28 = vadd.f32 %v1312_v26, %v2969_v3 }
0x1951   :  { %2505 = vtanh.f32 %v1314_v28  ;;  %v2108_v29 = vmul.f32 -1.442695, %v1314_v28 }
0x1953   :  { %2507 = vpow2.f32 %v2108_v29 }
0x195e   :  { %v2506_v13 = vpop.eup %2505 }
0x195f   :  { %1327 = vrot.lane.b32.xlu1 %v2506_v13, %s2654_s0 }
0x1960   :  { %v2508_v31 = vpop.eup %2507 }
0x1961   :  { %v1318_v32 = vadd.f32 1.0, %v2508_v31 }
0x1963   :  { %2509 = vrcp.f32 %v1318_v32 }
0x1970   :  { %v2510_v33 = vpop.eup %2509 }
0x1971   :  { %v1325_v37 = vmul.f32 %v2510_v33, %v1323_v36 }
0x19d1   :  { %v1328_v34 = vpop.permute.xlu1 %1327 }
0x19d2   :  { %v1330_v35 = vmul.f32 %v2510_v33, %v1328_v34 }
0x19d4   :  { %1332 = vrot.lane.b32.xlu0 %v1330_v35, %s2655_s2 }
0x1a46   :  { %v1333_v38 = vpop.permute.xlu0 %1332 }
0x1a47   :  { %v1335_v39 = vadd.f32 %v1333_v38, %v1325_v37 }
0x1a49   :  { %2511 = vtanh.f32 %v1335_v39  ;;  %v1430_v4 = vrot.slane %v1335_v39, 6 }
0x1a56   :  { %v2512_v40 = vpop.eup %2511 }
0x1a57   :  { %1338 = vrot.lane.b32.xlu1 %v2512_v40, %s2654_s0 }
0x1ac9   :  { %v1339_v41 = vpop.permute.xlu1 %1338 }
0x1aca   :  { %v1341_v42 = vmul.f32 %v2510_v33, %v1339_v41 }
0x1acc   :  { %v1343_v11 = vrot.slane %v1341_v42, 2 }
0x1ace   :  { %1344 = vrot.lane.b32.xlu0 %v1343_v11, %s2655_s2 }
0x1b40   :  { %v1345_v43 = vpop.permute.xlu0 %1344 }
0x1b41   :  { %2355 = vmatmul.mubr.msk.f32.vlgmr.msra.gmra.mxu0 %vm167_vm3, %v1345_v43 }
0x1b42   :  { %2369 = vmatpush3.msra.mxu0 %v2914_v51  ;;  %2376 = vmatprep.mubr.msk.f32.mxu0 %vm2653_vm0, %v2652_v0 }
0x1b43   :  { %2370 = vmatprep.subr.mxu0 %v2652_v0 }
0x1b44   :  { %2371 = vmatpush3.msra.mxu0 %v2917_v52 }
0x1b45   :  { %2372 = vmatprep.subr.mxu0 %v2652_v0 }
0x1b46   :  { %2373 = vmatpush3.msra.mxu0 %v2923_v53 }
0x1b47   :  { %2374 = vmatprep.subr.mxu0 %v2652_v0 }
0x1b48   :  { %2375 = vmatpush3.msra.mxu0 %v2932_v54 }
0x1b49   :  { %2390 = vmatprep.subr.mxu0 %v2652_v0 }
0x1c01   :  { %v1414_v44 = vpop.f32.mrf.mxu0 }
0x1c02   :  { %v1419_v45 = vrot.slane %v1414_v44, 4 }
0x1c03   :  { %v2356_v46 = vpop.f32.mrf.mxu0 }
0x1c04   :  { %v1421_v47 = vadd.f32 %v1419_v45, %v2969_v3 }
0x1c06   :  { %2513 = vtanh.f32 %v1421_v47  ;;  %v2110_v30 = vmul.f32 -1.442695, %v1421_v47 }
0x1c08   :  { %2515 = vpow2.f32 %v2110_v30 }
0x1c13   :  { %v2514_v48 = vpop.eup %2513 }
0x1c14   :  { %1434 = vrot.lane.b32.xlu1 %v2514_v48, %s2654_s0 }
0x1c15   :  { %v2516_v49 = vpop.eup %2515 }
0x1c16   :  { %v1425_v50 = vadd.f32 1.0, %v2516_v49 }
0x1c18   :  { %2517 = vrcp.f32 %v1425_v50 }
0x1c25   :  { %v2518_v9 = vpop.eup %2517 }
0x1c26   :  { %v1432_v56 = vmul.f32 %v2518_v9, %v1430_v4 }
0x1c86   :  { %v1435_v2 = vpop.permute.xlu1 %1434 }
0x1c87   :  { %v1437_v55 = vmul.f32 %v2518_v9, %v1435_v2 }
0x1c89   :  { %1439 = vrot.lane.b32.xlu0 %v1437_v55, %s2655_s2 }
0x1cfb   :  { %v1440_v57 = vpop.permute.xlu0 %1439 }
0x1cfc   :  { %v1442_v7 = vadd.f32 %v1440_v57, %v1432_v56 }
0x1cfe   :  { %2519 = vtanh.f32 %v1442_v7  ;;  %v1537_v19 = vrot.slane %v1442_v7, 6 }
0x1d0b   :  { %v2520_v58 = vpop.eup %2519 }
0x1d0c   :  { %1445 = vrot.lane.b32.xlu1 %v2520_v58, %s2654_s0 }
0x1d7e   :  { %v1446_v59 = vpop.permute.xlu1 %1445 }
0x1d7f   :  { %v1448_v8 = vmul.f32 %v2518_v9, %v1446_v59 }
0x1d81   :  { %v1450_v60 = vrot.slane %v1448_v8, 4 }
0x1d83   :  { %1451 = vrot.lane.b32.xlu0 %v1450_v60, %s2655_s2 }
0x1df5   :  { %v1452_v61 = vpop.permute.xlu0 %1451 }
0x1df6   :  { %2366 = vmatmul.mubr.msk.f32.vlgmr.msra.gmra.mxu1 %vm167_vm3, %v1452_v61 }
0x1df7   :  { %2380 = vmatpush3.msra.mxu1 %v2914_v51  ;;  %2387 = vmatprep.mubr.msk.f32.mxu1 %vm2653_vm0, %v2652_v0 }
0x1df8   :  { %2381 = vmatprep.subr.mxu1 %v2652_v0 }
0x1df9   :  { %2382 = vmatpush3.msra.mxu1 %v2917_v52 }
0x1dfa   :  { %2383 = vmatprep.subr.mxu1 %v2652_v0 }
0x1dfb   :  { %2384 = vmatpush3.msra.mxu1 %v2923_v53 }
0x1dfc   :  { %2385 = vmatprep.subr.mxu1 %v2652_v0 }
0x1dfd   :  { %2386 = vmatpush3.msra.mxu1 %v2932_v54 }
0x1dfe   :  { %2401 = vmatprep.subr.mxu1 %v2652_v0 }
0x1eb6   :  { %v1521_v62 = vpop.f32.mrf.mxu1 }
0x1eb7   :  { %v1526_v1 = vrot.slane %v1521_v62, 2 }
0x1eb8   :  { %v2367_v5 = vpop.f32.mrf.mxu1 }
0x1eb9   :  { %v1528_v6 = vadd.f32 %v1526_v1, %v2969_v3 }
0x1ebb   :  { %2521 = vtanh.f32 %v1528_v6  ;;  %v2112_v12 = vmul.f32 -1.442695, %v1528_v6 }
0x1ebd   :  { %2523 = vpow2.f32 %v2112_v12 }
0x1ec8   :  { %v2522_v10 = vpop.eup %2521 }
0x1ec9   :  { %1541 = vrot.lane.b32.xlu1 %v2522_v10, %s2654_s0 }
0x1eca   :  { %v2524_v14 = vpop.eup %2523 }
0x1ecb   :  { %v1532_v15 = vadd.f32 1.0, %v2524_v14 }
0x1ecd   :  { %2525 = vrcp.f32 %v1532_v15 }
0x1eda   :  { %v2526_v16 = vpop.eup %2525 }
0x1edb   :  { %v1539_v20 = vmul.f32 %v2526_v16, %v1537_v19 }
0x1f3b   :  { %v1542_v17 = vpop.permute.xlu1 %1541 }
0x1f3c   :  { %v1544_v18 = vmul.f32 %v2526_v16, %v1542_v17 }
0x1f3e   :  { %1546 = vrot.lane.b32.xlu0 %v1544_v18, %s2655_s2 }
0x1fb0   :  { %v1547_v21 = vpop.permute.xlu0 %1546 }
0x1fb1   :  { %v1549_v22 = vadd.f32 %v1547_v21, %v1539_v20 }
0x1fb3   :  { %2527 = vtanh.f32 %v1549_v22  ;;  %v1641_v37 = vrot.slane %v1549_v22, 6 }
0x1fc0   :  { %v2528_v3 = vpop.eup %2527 }
0x1fc1   :  { %1552 = vrot.lane.b32.xlu1 %v2528_v3, %s2654_s0 }
0x2033   :  { %v1553_v23 = vpop.permute.xlu1 %1552 }
0x2034   :  { %v1555_v24 = vmul.f32 %v2526_v16, %v1553_v23 }
0x2036   :  { %v1557_v25 = vrot.slane %v1555_v24, 6 }
0x2038   :  { %1558 = vrot.lane.b32.xlu0 %v1557_v25, %s2655_s2 }
0x20aa   :  { %v1559_v26 = vpop.permute.xlu0 %1558 }
0x20ab   :  { %2377 = vmatmul.mubr.msk.f32.vlgmr.msra.gmra.mxu0 %vm167_vm3, %v1559_v26 }
0x20ac   :  { %2391 = vmatpush3.msra.mxu0 %v2914_v51  ;;  %2398 = vmatprep.mubr.msk.f32.mxu0 %vm2653_vm0, %v2652_v0 }
0x20ad   :  { %2392 = vmatprep.subr.mxu0 %v2652_v0 }
0x20ae   :  { %2393 = vmatpush3.msra.mxu0 %v2917_v52 }
0x20af   :  { %2394 = vmatprep.subr.mxu0 %v2652_v0 }
0x20b0   :  { %2395 = vmatpush3.msra.mxu0 %v2923_v53 }
0x20b1   :  { %2396 = vmatprep.subr.mxu0 %v2652_v0 }
0x20b2   :  { %2397 = vmatpush3.msra.mxu0 %v2932_v54 }
0x20b3   :  { %2412 = vmatprep.subr.mxu0 %v2652_v0 }
0x216b   :  { %v1628_v27 = vpop.f32.mrf.mxu0 }
0x216c   :  { %v1632_v28 = vadd.f32 %v1628_v27, %v2967_v63 }
0x216d   :  { %v2378_v13 = vpop.f32.mrf.mxu0 }
0x216e   :  { %2529 = vtanh.f32 %v1632_v28  ;;  %v2114_v31 = vmul.f32 -1.442695, %v1632_v28 }
0x2170   :  { %2531 = vpow2.f32 %v2114_v31 }
0x217b   :  { %v2530_v29 = vpop.eup %2529 }
0x217c   :  { %1645 = vrot.lane.b32.xlu1 %v2530_v29, %s2654_s0 }
0x217d   :  { %v2532_v32 = vpop.eup %2531 }
0x217e   :  { %v1636_v33 = vadd.f32 1.0, %v2532_v32 }
0x2180   :  { %2533 = vrcp.f32 %v1636_v33 }
0x218d   :  { %v2534_v34 = vpop.eup %2533 }
0x218e   :  { %v1643_v38 = vmul.f32 %v2534_v34, %v1641_v37 }
0x21ee   :  { %v1646_v35 = vpop.permute.xlu1 %1645 }
0x21ef   :  { %v1648_v36 = vmul.f32 %v2534_v34, %v1646_v35 }
0x21f1   :  { %1650 = vrot.lane.b32.xlu0 %v1648_v36, %s2655_s2 }
0x2263   :  { %v1651_v39 = vpop.permute.xlu0 %1650 }
0x2264   :  { %v1653_v40 = vadd.f32 %v1651_v39, %v1643_v38  ;;  %v1982_v38 = vld [vmem:[%s3095_s7 + $0x10] sm:$0xff]  ;;  %v1981_v39 = vld [vmem:[%s3095_s7 + $0x8] sm:$0xff] }
0x2266   :  { %2535 = vtanh.f32 %v1653_v40 }
0x2273   :  { %v2536_v41 = vpop.eup %2535 }
0x2274   :  { %1656 = vrot.lane.b32.xlu1 %v2536_v41, %s2654_s0 }
0x22e6   :  { %v1657_v42 = vpop.permute.xlu1 %1656 }
0x22e7   :  { %v1659_v11 = vmul.f32 %v2534_v34, %v1657_v42 }
0x22e9   :  { %1661 = vrot.lane.b32.xlu0 %v1659_v11, %s2655_s2 }
0x235b   :  { %v1662_v43 = vpop.permute.xlu0 %1661 }
0x235c   :  { %2388 = vmatmul.mubr.msk.f32.vlgmr.msra.gmra.mxu1 %vm167_vm3, %v1662_v43 }
0x235d   :  { %2402 = vmatpush3.msra.mxu1 %v2914_v51  ;;  %2409 = vmatprep.mubr.msk.f32.mxu1 %vm2653_vm0, %v2652_v0 }
0x235e   :  { %2403 = vmatprep.subr.mxu1 %v2652_v0 }
0x235f   :  { %2404 = vmatpush3.msra.mxu1 %v2917_v52 }
0x2360   :  { %2405 = vmatprep.subr.mxu1 %v2652_v0 }
0x2361   :  { %2406 = vmatpush3.msra.mxu1 %v2923_v53 }
0x2362   :  { %2407 = vmatprep.subr.mxu1 %v2652_v0 }
0x2363   :  { %2408 = vmatpush3.msra.mxu1 %v2932_v54  ;;  %v1747_v54 = vrot.slane %v1653_v40, 6  ;;  %v1980_v40 = vld [vmem:[%s3095_s7] sm:$0xff] }
0x241c   :  { %v1731_v44 = vpop.f32.mrf.mxu1 }
0x241d   :  { %v1736_v45 = vrot.slane %v1731_v44, 6 }
0x241e   :  { %v2389_v46 = vpop.f32.mrf.mxu1 }
0x241f   :  { %v1738_v51 = vadd.f32 %v1736_v45, %v2967_v63  ;;  %v2121_v45 = vld [vmem:[#allocation8] ss:$0 sm:$0xff] }
0x2421   :  { %2537 = vtanh.f32 %v1738_v51  ;;  %v2116_v48 = vmul.f32 -1.442695, %v1738_v51 }
0x2423   :  { %2539 = vpow2.f32 %v2116_v48 }
0x242e   :  { %v2538_v47 = vpop.eup %2537 }
0x242f   :  { %1751 = vrot.lane.b32.xlu1 %v2538_v47, %s2654_s0 }
0x2430   :  { %v2540_v52 = vpop.eup %2539 }
0x2431   :  { %v1742_v30 = vadd.f32 1.0, %v2540_v52 }
0x2433   :  { %2541 = vrcp.f32 %v1742_v30 }
0x2440   :  { %v2542_v49 = vpop.eup %2541 }
0x2441   :  { %v1749_v9 = vmul.f32 %v2542_v49, %v1747_v54 }
0x24a1   :  { %v1752_v53 = vpop.permute.xlu1 %1751 }
0x24a2   :  { %v1754_v50 = vmul.f32 %v2542_v49, %v1752_v53 }
0x24a4   :  { %1756 = vrot.lane.b32.xlu0 %v1754_v50, %s2655_s2 }
0x2516   :  { %v1757_v2 = vpop.permute.xlu0 %1756 }
0x2517   :  { %v1759_v55 = vadd.f32 %v1757_v2, %v1749_v9 }
0x2519   :  { %2543 = vtanh.f32 %v1759_v55  ;;  %v1854_v15 = vrot.slane %v1759_v55, 6 }
0x2526   :  { %v2544_v4 = vpop.eup %2543 }
0x2527   :  { %1762 = vrot.lane.b32.xlu1 %v2544_v4, %s2654_s0 }
0x2599   :  { %v1763_v56 = vpop.permute.xlu1 %1762 }
0x259a   :  { %v1765_v57 = vmul.f32 %v2542_v49, %v1763_v56 }
0x259c   :  { %v1767_v7 = vrot.slane %v1765_v57, 2 }
0x259e   :  { %1768 = vrot.lane.b32.xlu0 %v1767_v7, %s2655_s2 }
0x2610   :  { %v1769_v58 = vpop.permute.xlu0 %1768 }
0x2611   :  { %2399 = vmatmul.mubr.msk.f32.vlgmr.msra.gmra.mxu0 %vm167_vm3, %v1769_v58 }
0x2612   :  { %2420 = vmatprep.mubr.msk.f32.mxu0 %vm2653_vm0, %v2652_v0 }
0x26d1   :  { %v1838_v59 = vpop.f32.mrf.mxu0 }
0x26d2   :  { %v1843_v8 = vrot.slane %v1838_v59, 4 }
0x26d3   :  { %v2400_v60 = vpop.f32.mrf.mxu0 }
0x26d4   :  { %v1845_v61 = vadd.f32 %v1843_v8, %v2967_v63 }
0x26d6   :  { %2545 = vtanh.f32 %v1845_v61  ;;  %v2118_v1 = vmul.f32 -1.442695, %v1845_v61 }
0x26d8   :  { %2547 = vpow2.f32 %v2118_v1 }
0x26e3   :  { %v2546_v62 = vpop.eup %2545 }
0x26e4   :  { %1858 = vrot.lane.b32.xlu1 %v2546_v62, %s2654_s0 }
0x26e5   :  { %v2548_v5 = vpop.eup %2547 }
0x26e6   :  { %v1849_v6 = vadd.f32 1.0, %v2548_v5 }
0x26e8   :  { %2549 = vrcp.f32 %v1849_v6 }
0x26f5   :  { %v2550_v10 = vpop.eup %2549 }
0x26f6   :  { %v1856_v16 = vmul.f32 %v2550_v10, %v1854_v15 }
0x2756   :  { %v1859_v12 = vpop.permute.xlu1 %1858 }
0x2757   :  { %v1861_v14 = vmul.f32 %v2550_v10, %v1859_v12 }
0x2759   :  { %1863 = vrot.lane.b32.xlu0 %v1861_v14, %s2655_s2 }
0x27cb   :  { %v1864_v17 = vpop.permute.xlu0 %1863 }
0x27cc   :  { %v1866_v18 = vadd.f32 %v1864_v17, %v1856_v16 }
0x27ce   :  { %2551 = vtanh.f32 %v1866_v18  ;;  %v1961_v34 = vrot.slane %v1866_v18, 6 }
0x27db   :  { %v2552_v19 = vpop.eup %2551 }
0x27dc   :  { %1869 = vrot.lane.b32.xlu1 %v2552_v19, %s2654_s0 }
0x284e   :  { %v1870_v20 = vpop.permute.xlu1 %1869 }
0x284f   :  { %v1872_v21 = vmul.f32 %v2550_v10, %v1870_v20 }
0x2851   :  { %v1874_v22 = vrot.slane %v1872_v21, 4 }
0x2853   :  { %1875 = vrot.lane.b32.xlu0 %v1874_v22, %s2655_s2 }
0x28c5   :  { %v1876_v3 = vpop.permute.xlu0 %1875 }
0x28c6   :  { %2410 = vmatmul.mubr.msk.f32.vlgmr.msra.gmra.mxu1 %vm167_vm3, %v1876_v3 }
0x2986   :  { %v1945_v23 = vpop.f32.mrf.mxu1 }
0x2987   :  { %v1950_v24 = vrot.slane %v1945_v23, 2 }
0x2988   :  { %v2411_v25 = vpop.f32.mrf.mxu1 }
0x2989   :  { %v1952_v26 = vadd.f32 %v1950_v24, %v2967_v63  ;;  %v1983_v63 = vld [vmem:[%s3095_s7 + $0x18] sm:$0xff]  ;;  %s2621_s7 = scalar_lea.vmem %s2076_s12, 32 }
0x298a   :  { %2413 = vmatpush3.msra.mxu0 %v1983_v63  ;;  %p2622_p1 = scmp.ne.s32.totalorder %s2076_s12, %s2621_s7  ;;  %p2627_p3 = scmp.lt.s32.totalorder %s2621_s7, %s2621_s7 }
0x298b   :  { %2553 = vtanh.f32 %v1952_v26  ;;  %v2120_v28 = vmul.f32 -1.442695, %v1952_v26  ;;  %2414 = vmatprep.subr.mxu0 %v2652_v0 }
0x298c   :  { %2415 = vmatpush3.msra.mxu0 %v1982_v38  ;;  %p2628_p4 = por %p2627_p3, %p2626_p2 }
0x298d   :  { %2555 = vpow2.f32 %v2120_v28  ;;  %2416 = vmatprep.subr.mxu0 %v2652_v0 }
0x298e   :  { %2417 = vmatpush3.msra.mxu0 %v1981_v39  ;;  %p2629_p5 = pnand %p2628_p4, %p2622_p1 }
0x298f   :  { %2418 = vmatprep.subr.mxu0 %v2652_v0 }
0x2990   :  { %2419 = vmatpush3.msra.mxu0 %v1980_v40 }
0x2998   :  { %v2554_v27 = vpop.eup %2553 }
0x2999   :  { %1965 = vrot.lane.b32.xlu1 %v2554_v27, %s2654_s0 }
0x299a   :  { %v2556_v13 = vpop.eup %2555 }
0x299b   :  { %v1956_v29 = vadd.f32 1.0, %v2556_v13 }
0x299d   :  { %2557 = vrcp.f32 %v1956_v29 }
0x29aa   :  { %v2558_v31 = vpop.eup %2557 }
0x29ab   :  { %v1963_v35 = vmul.f32 %v2558_v31, %v1961_v34 }
0x2a0b   :  { %v1966_v32 = vpop.permute.xlu1 %1965 }
0x2a0c   :  { %v1968_v33 = vmul.f32 %v2558_v31, %v1966_v32 }
0x2a0e   :  { %1970 = vrot.lane.b32.xlu0 %v1968_v33, %s2655_s2 }
0x2a80   :  { %v1971_v36 = vpop.permute.xlu0 %1970 }
0x2a81   :  { %v1973_v37 = vadd.f32 %v1971_v36, %v1963_v35 }
0x2a83   :  { %2559 = vtanh.f32 %v1973_v37 }
0x2a90   :  { %v2560_v41 = vpop.eup %2559 }
0x2a91   :  { %1976 = vrot.lane.b32.xlu1 %v2560_v41, %s2654_s0 }
0x2b03   :  { %v1977_v42 = vpop.permute.xlu1 %1976 }
0x2b04   :  { %v1979_v11 = vmul.f32 %v2558_v31, %v1977_v42 }
0x2b06   :  { %v1992_v43 = vrot.slane %v1979_v11, 6 }
0x2b08   :  { %1993 = vrot.lane.b32.xlu0 %v1992_v43, %s2655_s2 }
0x2b7a   :  { %v1994_v44 = vpop.permute.xlu0 %1993 }
0x2b7b   :  { %2421 = vmatmul.mubr.msk.f32.vlgmr.msra.gmra.mxu0 %vm167_vm3, %v1994_v44 }
0x2c3b   :  { %v2063_v46 = vpop.f32.mrf.mxu0 }
0x2c3c   :  { %v2064_v51 = vadd.f32 %v2121_v45, %v2063_v46 }
0x2c3d   :  { %v2422_v0 = vpop.f32.mrf.mxu0 }
0x2c3e   :  { %2068 = vst.msk [vmem:[#allocation9] sm:$0x3] %vm2067_vm7, %v2064_v51 }
0x2c3f   :  { %2632 = shalt.err (!%p2629_p5)
}
0x2c40   :  { %2078 = dma.vmem_to_hbm [thread:$0]  %s2076_s12, 32, %s3097_s9, [#allocation5]  }
0x2c41   :  { %2645 = dma.done.wait [#allocation5], 32  }
0x2c42   :  { %2646 = vsyncadd [#allocation5], 4294967264 }
0x2c43   :  { %2082 = vsyncpa [#allocation4], 1 }
0x2c44   :  { %2083 = vsyncpa [#allocation7], 1 }
0x2c45   :  { %2084 = vsyncpa [#allocation5], 1 }

</bundles_post_ra>
